<compile_context>
chip_gen: v5e
topology: v5e:2x2
jax: 0.10.0
libtpu: 0.0.40
codegen_flags: <defaults>
</compile_context>

<pallas_src>
import jax
import jax.numpy as jnp
import numpy as np
from jax.experimental import pallas as pl
from jax.experimental.pallas import tpu as pltpu

D_INNER = 2048   # "d" in the PyTorch module __init__
LANES = 128
SUBLANES = 8
# Keep at least this many M-tiles so the "parallel" grid axis can be sharded
# across both TensorCores on v7x and the pipeline has work to overlap.
MIN_GRID_STEPS = 4


def _round_up(n, m):
    return (n + m - 1) // m * m


def _cdiv(a, b):
    return (a + b - 1) // b


# ----------------------------- Pallas kernel -----------------------------

def _mlp_head_kernel(x_ref, w1_ref, b1_ref, w2_ref, b2_ref, o_ref, h_ref):
    """One (TM, H) activation tile -> (TM, Cp) tile of (x @ w1 + b1) @ w2 + b2."""
    # Linear(H -> d): bf16 operands on the MXU, f32 accumulation.
    # (.astype is a no-op if the backbone already emits bf16 hidden states.)
    h = jnp.dot(x_ref[...].astype(jnp.bfloat16), w1_ref[...],
                preferred_element_type=jnp.float32)
    # Bias added in f32, then the (TM, d) intermediate is parked in *bf16*
    # VMEM scratch (numerically identical to an f32 scratch since the second
    # matmul consumed bf16 anyway; halves scratch VMEM + vst/vld traffic).
    h_ref[...] = (h + b1_ref[...]).astype(jnp.bfloat16)
    # nn.Dropout(p=0.2) is the identity in eval mode.
    # Linear(d -> C): bf16 operands straight from scratch, f32 accumulation.
    out = jnp.dot(h_ref[...], w2_ref[...], preferred_element_type=jnp.float32)
    o_ref[...] = (out + b2_ref[...]).astype(o_ref.dtype)


def prepare_head_params(w1, b1, w2, b2):
    """One-time parameter prep for the kernel (NOT done per forward call).

    Weights -> bf16 (MXU-native), biases kept f32 as (1, n) rows, and the
    output-class axis zero-padded up to a multiple of 128 lanes so the output
    store is lane-dense (unmasked vst).
    """
    d = w1.shape[1]
    c = w2.shape[1]
    cp = _round_up(max(c, LANES), LANES)
    return {
        "w1": w1.astype(jnp.bfloat16),
        "b1": b1.reshape(1, d).astype(jnp.float32),
        "w2": jnp.zeros((d, cp), jnp.bfloat16).at[:, :c].set(w2.astype(jnp.bfloat16)),
        "b2": jnp.zeros((1, cp), jnp.float32).at[:, :c].set(
            b2.reshape(1, c).astype(jnp.float32)),
        "num_classes": c,
    }


def prepare_intent_params(w1, b1, w2, b2):
    """Intent head stays in XLA, but its weights are bf16-prepped once too."""
    return {
        "w1": w1.astype(jnp.bfloat16),
        "b1": b1.astype(jnp.float32),
        "w2": w2.astype(jnp.bfloat16),
        "b2": b2.astype(jnp.float32),
    }


def mlp_head_pallas(x, head, *, tm=512):
    """(x @ w1 + b1) @ w2 + b2 with the token axis tiled over the grid.

    x: (M, H) float32 or bfloat16; head: dict from prepare_head_params.
    Returns (M, num_classes) float32.
    """
    M, H = x.shape
    w1, b1, w2, b2 = head["w1"], head["b1"], head["w2"], head["b2"]
    c = head["num_classes"]
    d = w1.shape[1]
    cp = w2.shape[1]

    # Clamp TM so the single parallel grid axis has >= MIN_GRID_STEPS tiles
    # (keeps both v7x TensorCores occupied) and stays a multiple of 8 sublanes.
    tm_cap = max(SUBLANES, _round_up(_cdiv(M, MIN_GRID_STEPS), SUBLANES))
    tm = min(tm, tm_cap)
    grid = (pl.cdiv(M, tm),)

    # Constant-index weight/bias blocks are single-buffered: their block never
    # changes across grid steps, so double buffering only wastes VMEM (matters
    # most on v5e's 16 MiB scoped limit and v7x's 64 MiB physical per-core).
    resident = pl.Buffered(1)

    out = pl.pallas_call(
        _mlp_head_kernel,
        out_shape=jax.ShapeDtypeStruct((M, cp), jnp.float32),
        grid_spec=pltpu.PrefetchScalarGridSpec(
            num_scalar_prefetch=0,
            grid=grid,
            in_specs=[
                # activations: streamed / double-buffered
                pl.BlockSpec((tm, H), lambda i: (i, 0)),
                # weights & biases: VMEM-resident, single-buffered
                pl.BlockSpec((H, d), lambda i: (0, 0), pipeline_mode=resident),
                pl.BlockSpec((1, d), lambda i: (0, 0), pipeline_mode=resident),
                pl.BlockSpec((d, cp), lambda i: (0, 0), pipeline_mode=resident),
                pl.BlockSpec((1, cp), lambda i: (0, 0), pipeline_mode=resident),
            ],
            out_specs=pl.BlockSpec((tm, cp), lambda i: (i, 0)),
            # bf16 intermediate scratch (half the VMEM / store traffic of f32).
            scratch_shapes=[pltpu.VMEM((tm, d), jnp.bfloat16)],
        ),
        compiler_params=pltpu.CompilerParams(
            # Independent M-tiles: shard across both TensorCores on v7x.
            dimension_semantics=("parallel",)),
    )(x, w1, b1, w2, b2)
    # Drop the lane padding of the class axis (cheap, narrow slice).
    return out[:, :c]


# ----------------------------- Model wrapper -----------------------------

def init_params(key, hidden_size, num_intent_classes, num_tag_classes):
    """Deterministic init mimicking nn.Linear defaults (uniform +/- 1/sqrt(fan_in))."""
    def linear(k, fan_in, fan_out):
        kw, kb = jax.random.split(k)
        bound = 1.0 / np.sqrt(fan_in)
        w = jax.random.uniform(kw, (fan_in, fan_out), jnp.float32, -bound, bound)
        b = jax.random.uniform(kb, (fan_out,), jnp.float32, -bound, bound)
        return w, b

    k1, k2, k3, k4 = jax.random.split(key, 4)
    iw1, ib1 = linear(k1, hidden_size, D_INNER)
    iw2, ib2 = linear(k2, D_INNER, num_intent_classes)
    tw1, tb1 = linear(k3, hidden_size, D_INNER)
    tw2, tb2 = linear(k4, D_INNER, num_tag_classes)
    return {
        "intent": (iw1, ib1, iw2, ib2),   # raw f32 (reference / prep source)
        "tag": (tw1, tb1, tw2, tb2),      # raw f32 (reference / prep source)
    }


def model_two_linear_forward(params, last_hidden_state):
    """last_hidden_state: (B, S, H) float32 (or bfloat16).

    Returns (intent, tag):
      intent: (B, num_intent_classes)      from token 0
      tag:    (B, S-1, num_tag_classes)    from tokens 1:
    """
    B, S, H = last_hidden_state.shape

    # Intent head: only B rows -- a tiny GEMM. A dedicated pallas_call would
    # DMA the full weight matrices for ~B rows of MXU work, so this stays in
    # XLA; bf16 weights (prepped once) halve its one-time HBM read.
    ip = params["intent_prepped"]
    cls = last_hidden_state[:, 0, :]                               # (B, H)
    ih = jnp.dot(cls.astype(jnp.bfloat16), ip["w1"],
                 preferred_element_type=jnp.float32) + ip["b1"]
    intent = jnp.dot(ih.astype(jnp.bfloat16), ip["w2"],
                     preferred_element_type=jnp.float32) + ip["b2"]

    # Tag head: run the kernel over the contiguous (B*S, H) view (avoids the
    # [:, 1:, :] strided-copy of the hidden states), then drop token-0 rows of
    # the narrow output.
    toks = last_hidden_state.reshape(B * S, H)                     # contiguous, free
    tag_all = mlp_head_pallas(toks, params["tag_prepped"])         # (B*S, n_tag)
    tag = tag_all.reshape(B, S, -1)[:, 1:, :]                      # (B, S-1, n_tag)
    return intent, tag


def _reference_forward(raw_params, last_hidden_state):
    iw1, ib1, iw2, ib2 = raw_params["intent"]
    tw1, tb1, tw2, tb2 = raw_params["tag"]
    cls = last_hidden_state[:, 0, :]
    intent = (cls @ iw1 + ib1) @ iw2 + ib2
    toks = last_hidden_state[:, 1:, :]
    tag = (toks @ tw1 + tb1) @ tw2 + tb2
    return intent, tag


# ----------------------------------- main -----------------------------------

if __name__ == "__main__":
    B, S, H = 2, 8, 128          # batch, seq, hidden size (small synthetic)
    NUM_INTENT, NUM_TAG = 7, 11

    key = jax.random.PRNGKey(0)
    k_param, k_x = jax.random.split(key)
    raw_params = init_params(k_param, H, NUM_INTENT, NUM_TAG)
    last_hidden_state = jax.random.normal(k_x, (B, S, H), jnp.float32)

    # One-time parameter prep (bf16 weights, lane-padded class axis).
    params = {
        "intent_prepped": prepare_intent_params(*raw_params["intent"]),
        "tag_prepped": prepare_head_params(*raw_params["tag"]),
    }

    intent, tag = model_two_linear_forward(params, last_hidden_state)
    intent = jax.block_until_ready(intent)
    tag = jax.block_until_ready(tag)

    ref_intent, ref_tag = _reference_forward(raw_params, last_hidden_state)
    assert intent.shape == (B, NUM_INTENT), intent.shape
    assert tag.shape == (B, S - 1, NUM_TAG), tag.shape
    # Both heads use bf16 MXU operands with f32 accumulation -> relaxed tolerance.
    np.testing.assert_allclose(np.asarray(intent), np.asarray(ref_intent),
                               rtol=2e-2, atol=2e-2)
    np.testing.assert_allclose(np.asarray(tag), np.asarray(ref_tag),
                               rtol=2e-2, atol=2e-2)

    print("KERNEL_OK")
</pallas_src>

<mosaic_0001>
module attributes {stable_mosaic.version = 11 : i64} {
  func.func @_mlp_head_kernel(%arg0: i32, %arg1: memref<8x128xf32, #tpu.memory_space<vmem>>, %arg2: memref<128x2048xbf16, #tpu.memory_space<vmem>>, %arg3: memref<1x2048xf32, #tpu.memory_space<vmem>>, %arg4: memref<2048x128xbf16, #tpu.memory_space<vmem>>, %arg5: memref<1x128xf32, #tpu.memory_space<vmem>>, %arg6: memref<8x128xf32, #tpu.memory_space<vmem>>, %arg7: memref<8x2048xbf16, #tpu.memory_space<vmem>>) attributes {dimension_semantics = [#tpu.dimension_semantics<parallel>], iteration_bounds = array<i64: 2>, scalar_prefetch = 0 : i64, scratch_operands = 1 : i64, tpu.core_type = #tpu.core_type<tc>, window_params = [{transform_indices = @transform_0, window_bounds = array<i64: 8, 128>}, {pipeline_mode = #tpu.pipeline_mode<synchronous>, transform_indices = @transform_1, window_bounds = array<i64: 128, 2048>}, {pipeline_mode = #tpu.pipeline_mode<synchronous>, transform_indices = @transform_2, window_bounds = array<i64: 1, 2048>}, {pipeline_mode = #tpu.pipeline_mode<synchronous>, transform_indices = @transform_3, window_bounds = array<i64: 2048, 128>}, {pipeline_mode = #tpu.pipeline_mode<synchronous>, transform_indices = @transform_4, window_bounds = array<i64: 1, 128>}, {transform_indices = @transform_5, window_bounds = array<i64: 8, 128>}]} {
    %c0 = arith.constant 0 : index
    %c0_0 = arith.constant 0 : index
    %0 = vector.load %arg1[%c0, %c0_0] : memref<8x128xf32, #tpu.memory_space<vmem>>, vector<8x128xf32>
    %1 = arith.truncf %0 : vector<8x128xf32> to vector<8x128xbf16>
    %c0_1 = arith.constant 0 : index
    %c0_2 = arith.constant 0 : index
    %2 = vector.load %arg2[%c0_1, %c0_2] : memref<128x2048xbf16, #tpu.memory_space<vmem>>, vector<128x2048xbf16>
    %cst = arith.constant dense<0.000000e+00> : vector<8x2048xf32>
    %3 = tpu.matmul %1, %2, %cst {dimension_numbers = #tpu.dot_dimension_numbers<[1], [0], [0], [1], [0, 0, 1, 1], [], []>} : vector<8x128xbf16>, vector<128x2048xbf16>, vector<8x2048xf32> -> vector<8x2048xf32>
    %c0_3 = arith.constant 0 : index
    %c0_4 = arith.constant 0 : index
    %4 = vector.load %arg3[%c0_3, %c0_4] : memref<1x2048xf32, #tpu.memory_space<vmem>>, vector<1x2048xf32>
    %5 = vector.broadcast %4 : vector<1x2048xf32> to vector<8x2048xf32>
    %6 = arith.addf %3, %5 : vector<8x2048xf32>
    %7 = arith.truncf %6 : vector<8x2048xf32> to vector<8x2048xbf16>
    %c0_5 = arith.constant 0 : index
    %c0_6 = arith.constant 0 : index
    %8 = vector.load %arg7[%c0_5, %c0_6] : memref<8x2048xbf16, #tpu.memory_space<vmem>>, vector<8x2048xbf16>
    tpu.vector_store %arg7[%c0_5, %c0_6], %7 {strides = array<i32>} : memref<8x2048xbf16, #tpu.memory_space<vmem>>, vector<8x2048xbf16>,
    %c0_7 = arith.constant 0 : index
    %c0_8 = arith.constant 0 : index
    %9 = vector.load %arg7[%c0_7, %c0_8] : memref<8x2048xbf16, #tpu.memory_space<vmem>>, vector<8x2048xbf16>
    %c0_9 = arith.constant 0 : index
    %c0_10 = arith.constant 0 : index
    %10 = vector.load %arg4[%c0_9, %c0_10] : memref<2048x128xbf16, #tpu.memory_space<vmem>>, vector<2048x128xbf16>
    %cst_11 = arith.constant dense<0.000000e+00> : vector<8x128xf32>
    %11 = tpu.matmul %9, %10, %cst_11 {dimension_numbers = #tpu.dot_dimension_numbers<[1], [0], [0], [1], [0, 0, 1, 1], [], []>} : vector<8x2048xbf16>, vector<2048x128xbf16>, vector<8x128xf32> -> vector<8x128xf32>
    %c0_12 = arith.constant 0 : index
    %c0_13 = arith.constant 0 : index
    %12 = vector.load %arg5[%c0_12, %c0_13] : memref<1x128xf32, #tpu.memory_space<vmem>>, vector<1x128xf32>
    %13 = vector.broadcast %12 : vector<1x128xf32> to vector<8x128xf32>
    %14 = arith.addf %11, %13 : vector<8x128xf32>
    %c0_14 = arith.constant 0 : index
    %c0_15 = arith.constant 0 : index
    %15 = vector.load %arg6[%c0_14, %c0_15] : memref<8x128xf32, #tpu.memory_space<vmem>>, vector<8x128xf32>
    tpu.vector_store %arg6[%c0_14, %c0_15], %14 {strides = array<i32>} : memref<8x128xf32, #tpu.memory_space<vmem>>, vector<8x128xf32>,
    return
  }
  func.func @transform_0(%arg0: i32) -> (i32, i32) {
    %c0_i32 = arith.constant 0 : i32
    %c0_i32_0 = arith.constant 0 : i32
    return %arg0, %c0_i32 : i32, i32
  }
  func.func @transform_1(%arg0: i32) -> (i32, i32) {
    %c0_i32 = arith.constant 0 : i32
    %c0_i32_0 = arith.constant 0 : i32
    %c0_i32_1 = arith.constant 0 : i32
    return %c0_i32, %c0_i32_0 : i32, i32
  }
  func.func @transform_2(%arg0: i32) -> (i32, i32) {
    %c0_i32 = arith.constant 0 : i32
    %c0_i32_0 = arith.constant 0 : i32
    %c0_i32_1 = arith.constant 0 : i32
    return %c0_i32, %c0_i32_0 : i32, i32
  }
  func.func @transform_3(%arg0: i32) -> (i32, i32) {
    %c0_i32 = arith.constant 0 : i32
    %c0_i32_0 = arith.constant 0 : i32
    %c0_i32_1 = arith.constant 0 : i32
    return %c0_i32, %c0_i32_0 : i32, i32
  }
  func.func @transform_4(%arg0: i32) -> (i32, i32) {
    %c0_i32 = arith.constant 0 : i32
    %c0_i32_0 = arith.constant 0 : i32
    %c0_i32_1 = arith.constant 0 : i32
    return %c0_i32, %c0_i32_0 : i32, i32
  }
  func.func @transform_5(%arg0: i32) -> (i32, i32) {
    %c0_i32 = arith.constant 0 : i32
    %c0_i32_0 = arith.constant 0 : i32
    return %arg0, %c0_i32 : i32, i32
  }
}

</mosaic_0001>

<bundles_post_ra>
// kernel: tpu_custom_call.1
= control target key start
LH: loop header
LB: loop body
LE: loop exit
PB: predicated region body
PF: predicated region fallthrough
CT: control target
= control target key end

     0   :  { %10 = vsyncpa [#allocation4], 0  ;;  %s4557_s0 = inlined_call_operand.hbm [shape: f32[16,128], index: 0, kind: input, shape index: {}]   ;;  %s4558_s1 = inlined_call_operand.hbm [shape: bf16[128,2048], index: 1, kind: input, shape index: {}]   ;;  %s4559_s2 = inlined_call_operand.hbm [shape: f32[1,2048], index: 2, kind: input, shape index: {}]   ;;  %s4560_s3 = inlined_call_operand.hbm [shape: bf16[2048,128], index: 3, kind: input, shape index: {}]   ;;  %s4561_s4 = inlined_call_operand.vmem [shape: f32[1,128], index: 4, kind: input, shape index: {}]   ;;  %s4562_s5 = inlined_call_operand.hbm [shape: f32[16,128], index: 5, kind: output, shape index: {}]  }
   0x1   :  { %12 = vsyncpa [#allocation4 + $0x1], 0 }
   0x2   :  { %13 = vsyncpa [#allocation7], 0 }
   0x3   :  { %14 = vsyncpa [#allocation10], 0 }
   0x4   :  { %15 = vsyncpa [#allocation5], 0 }
   0x5   :  { %17 = vsyncpa [#allocation5 + $0x1], 0  ;;  %s4347_s18 = smov 0   ;;  %s4349_s19 = smov 0  }
   0x6   :  { %s4351_s20 = smov 0   ;;  %s4353_s21 = smov 0  }
   0x7 LB: > { %s175_s24 = sshll.u32 %s4558_s1, 4  ;;  %s4371_s25 = sadd.s32 4294967295, %s4309_s21   ;;  %s4309_s21 = sphi %s4353_s21, %s4574_s21   ;;  %s4305_s20 = sphi %s4351_s20, %s4573_s20   ;;  %s4301_s19 = sphi %s4349_s19, %s4572_s19   ;;  %s4297_s18 = sphi %s4347_s18, %s4571_s18   ;;  %s176_s24 = int_to_ptr.hbm [resolvable:$true] %s175_s24 }
   0x8   : > { %p2737_p0 = scmp.ge.s32.totalorder %s4309_s21, 1  ;;  %p44_p1 = scmp.eq.s32.totalorder %s4371_s25, 0 }
   0x9   : > { %p164_p2 = scmp.lt.s32.totalorder %s4309_s21, 3  ;;  %s4311_s27 = smov [#allocation6]  }
   0xa   : > { %s177_s28 = sshll.u32 %s4311_s27, 4  ;;  %s190_s6 = sshll.u32 %s4559_s2, 4  ;;  %s178_s28 = int_to_ptr.vmem [resolvable:$true] %s177_s28  ;;  %s191_s6 = int_to_ptr.hbm [resolvable:$true] %s190_s6 }
   0xb   : > { %p4376_p3 = pnand %p2737_p0, %p164_p2  ;;  %s201_s10 = sshll.u32 %s4560_s3, 4  ;;  %s202_s10 = int_to_ptr.hbm [resolvable:$true] %s201_s10 }
   0xc   : > { %s4312_s11 = smov [#allocation8]   ;;  %s4313_s13 = smov 1024  }
   0xd   : > { %p4050_p4 = pneg %p4376_p3  ;;  %s192_s12 = sshll.u32 %s4312_s11, 4  ;;  %s193_s12 = int_to_ptr.vmem [resolvable:$true] %s192_s12 }
   0xe   : > { %s4314_s14 = smov 64   ;;  %s4315_s15 = smov [#allocation9]  }
   0xf   : > { %p4388_p6 = pnand %p4050_p4, %p44_p1  ;;  %s203_s16 = sshll.u32 %s4315_s15, 4  ;;  %s204_s16 = int_to_ptr.vmem [resolvable:$true] %s203_s16 }
  0x10   : > { %s4316_s17 = smov 4   ;;  %s2736_s22 = sadd.s32 4294967294, %s4309_s21  }
  0x11   : > { %4053 = dma.hbm_to_vmem [thread:$0]  (!%p4388_p6), %s176_s24, 16384, %s178_s28, [#allocation7], %s4313_s13, %s4313_s13, %s4314_s14  }
  0x12   : > { %4056 = dma.hbm_to_vmem [thread:$0]  (!%p4388_p6), %s191_s6, 256, %s193_s12, [#allocation7]  }
  0x13   : > { %4059 = dma.hbm_to_vmem [thread:$0]  (!%p4388_p6), %s202_s10, 16384, %s204_s16, [#allocation10], %s4314_s14, %s4314_s14, %s4316_s17  }
  0x14   : > { %s4403_s23 = sadd.s32 1, %s4309_s21   ;;  %s30_s27 = sadd.s32 1, %s4305_s20 }
  0x15   : > { %s27_s24 = ssub.s32 %s4309_s21, %s4403_s23  ;;  %p37_p8 = scmp.ne.s32.totalorder %s4305_s20, %s4301_s19 }
  0x16   : > { %p28_p7 = scmp.eq.s32.totalorder %s27_s24, 0  ;;  %p38_p9 = scmp.eq.s32.totalorder %s4309_s21, 0 }
  0x17   : > { %p43_p10 = scmp.ne.s32.totalorder %s4301_s19, %s4297_s18  ;;  %p151_p13 = scmp.eq.s32.totalorder %s4371_s25, 1 }
  0x18   : > { %s4414_s28 = scalar_select %p28_p7, %s4305_s20, %s30_s27  }
  0x19   : > { %p4416_p11 = por %p38_p9, %p37_p8  ;;  %p4422_p12 = por %p44_p1, %p43_p10 }
  0x1a   : > { %p157_p0 = scmp.eq.s32.totalorder %s2736_s22, 1  ;;  %p4071_p2 = scmp.lt.s32.totalorder %s4309_s21, 2 }
  0x1b   : > { %s220_s6 = sand.u32 1, %s4305_s20   ;;  %p4429_p4 = por %p151_p13, %p37_p8 }
  0x1c   : > { %p4433_p6 = por %p157_p0, %p43_p10  ;;  %s2742_s9 = sshll.u32 %s220_s6, 3 }
  0x1d   : > { %s2743_s10 = sshll.u32 %s4309_s21, 3  ;;  %s224_s14 = scalar_lea.vmem [#allocation3], %s2742_s9 }
  0x1e   : > { %s228_s13 = scalar_lea.hbm %s4557_s0, %s2743_s10  ;;  %s232_s15 = sshll.u32 %s224_s14, 4  ;;  %s233_s15 = int_to_ptr.vmem [resolvable:$true] %s232_s15 }
  0x1f   : > { %s230_s16 = sshll.u32 %s228_s13, 4  ;;  %p4443_p7 = pnand %p4071_p2, %p4416_p11  ;;  %s231_s16 = int_to_ptr.hbm [resolvable:$true] %s230_s16 }
  0x20   : > { %s221_s22 = scalar_lea.sflag [#allocation4], %s220_s6  ;;  %s4205_s24 = sshra.s32 %s231_s16, 4  ;;  %s4206_s24 = int_to_ptr.hbm [resolvable:$true] %s4205_s24 }
  0x21   : > { %s4207_s27 = scalar_lea.hbm %s4206_s24, 8  ;;  %p4209_p9 = pneg %p4443_p7 }
  0x22   : > { %p4208_p8 = scmp.ne.s32.totalorder %s4206_s24, %s4207_s27  ;;  %s4212_s11 = scalar_lea.hbm %s4557_s0, 16 }
  0x23   : > { %p4213_p11 = scmp.lt.s32.totalorder %s4206_s24, %s4557_s0  ;;  %p4214_p0 = scmp.lt.s32.totalorder %s4212_s11, %s4207_s27 }
  0x24   : > { %p4210_p10 = pnand %p4209_p9, %p4208_p8 }
  0x25   : > { %p4215_p2 = por %p4214_p0, %p4213_p11 }
  0x26   : > { %p4211_p13 = pneg %p4210_p10 }
  0x28   : > { %p4216_p5 = pnand %p4215_p2, %p4211_p13 }
  0x2a   : > { %4219 = shalt.err (!%p4216_p5)
}
  0x2b   : > { %4063 = dma.hbm_to_vmem [thread:$0]  (!%p4443_p7), %s231_s16, 128, %s233_s15, %s221_s22  }
  0x2c   : > { %241 = sbr.rel (%p4376_p3) target bundleno = 467 (0x1d3), region = 40  ;;  %s4460_s6 = sand.u32 (!%p4376_p3), 1, %s4301_s19  }
  0x2d   : > { %s2745_s13 = sshll.u32 (!%p4376_p3), %s4460_s6, 3  ;;  %s244_s14 = scalar_lea.sflag (!%p4376_p3), [#allocation4], %s4460_s6 }
  0x2e   : > { %s4466_s24 = scalar_lea.vmem (!%p4376_p3), [#allocation3], %s2745_s13 }
  0x31   : > { %4280 = dma.done.wait (%p4422_p12), %s244_s14, 128  }
  0x32   : > { %4282 = vsyncadd (%p4422_p12), %s244_s14, 4294967168 }
  0x33   : > { %4284 = dma.done.wait (%p44_p1), [#allocation7], 16640  }
  0x34   : > { %4286 = vsyncadd (%p44_p1), [#allocation7], 4294950656 }
  0x35   : > { %4288 = dma.done.wait (%p44_p1), [#allocation10], 16384  }
  0x36   : > { %4290 = vsyncadd (%p44_p1), [#allocation10], 4294950912  ;;  %v3200_v0 = vld [vmem:[#allocation6 + $0x380] sm:$0xf]  ;;  %v3890_v2 = vld [vmem:[#allocation6 + $0x384] sm:$0xf] }
  0x37   : > { %v3898_v1 = vld [vmem:[#allocation6 + $0x3bc] sm:$0xf0]  ;;  %v3202_v4 = vld [vmem:[#allocation6 + $0x3c0] sm:$0xf0]  ;;  %v3208_v5 = vld [vmem:[#allocation6 + $0x388] sm:$0xf] }
  0x38   : > { %v3201_v3 = vor.u32 %v3898_v1, %v3200_v0  ;;  %v3899_v6 = vld [vmem:[#allocation6 + $0x3c4] sm:$0xf0]  ;;  %v3205_v7 = vor.u32 %v3890_v2, %v3202_v4  ;;  %v3891_v9 = vld [vmem:[#allocation6 + $0x38c] sm:$0xf]  ;;  %v3136_v11 = vld [vmem:[#allocation6 + $0x300] sm:$0xf] }
  0x39   : > { %v3209_v8 = vor.u32 %v3899_v6, %v3208_v5  ;;  %v3210_v10 = vld [vmem:[#allocation6 + $0x3c8] sm:$0xf0]  ;;  %v3882_v13 = vld [vmem:[#allocation6 + $0x33c] sm:$0xf0]  ;;  %v3874_v14 = vld [vmem:[#allocation6 + $0x304] sm:$0xf] }
  0x3a   : > { %1096 = vmatpush.bf16.msra.mxu0 %v3201_v3  ;;  %v3213_v12 = vor.u32 %v3891_v9, %v3210_v10  ;;  %v3138_v15 = vld [vmem:[#allocation6 + $0x340] sm:$0xf0]  ;;  %1109 = vmatpush.bf16.msra.mxu1 %v3205_v7  ;;  %v3137_v16 = vor.u32 %v3882_v13, %v3136_v11  ;;  %v3144_v18 = vld [vmem:[#allocation6 + $0x308] sm:$0xf]  ;;  %v3875_v20 = vld [vmem:[#allocation6 + $0x30c] sm:$0xf] }
  0x3b   : > { %1122 = vmatpush.bf16.msra.mxu2 %v3209_v8  ;;  %v3141_v17 = vor.u32 %v3874_v14, %v3138_v15  ;;  %v3883_v19 = vld [vmem:[#allocation6 + $0x344] sm:$0xf0]  ;;  %v3146_v22 = vld [vmem:[#allocation6 + $0x348] sm:$0xf0]  ;;  %v3072_v23 = vld [vmem:[#allocation6 + $0x280] sm:$0xf] }
  0x3c   : > { %1135 = vmatpush.bf16.msra.mxu3 %v3213_v12  ;;  %v3145_v21 = vor.u32 %v3883_v19, %v3144_v18  ;;  %v3866_v24 = vld [vmem:[#allocation6 + $0x2bc] sm:$0xf0]  ;;  %v3149_v25 = vor.u32 %v3875_v20, %v3146_v22  ;;  %v3858_v26 = vld [vmem:[#allocation6 + $0x284] sm:$0xf]  ;;  %v3080_v28 = vld [vmem:[#allocation6 + $0x288] sm:$0xf] }
  0x3d   : > { %v3074_v27 = vld [vmem:[#allocation6 + $0x2c0] sm:$0xf0]  ;;  %v3073_v29 = vor.u32 %v3866_v24, %v3072_v23  ;;  %v3867_v30 = vld [vmem:[#allocation6 + $0x2c4] sm:$0xf0]  ;;  %v3859_v31 = vld [vmem:[#allocation6 + $0x28c] sm:$0xf] }
  0x3e   : > { %1097 = vmatpush.bf16.msra.mxu0 %v3137_v16  ;;  %v3082_v32 = vld [vmem:[#allocation6 + $0x2c8] sm:$0xf0]  ;;  %1110 = vmatpush.bf16.msra.mxu1 %v3141_v17  ;;  %v3077_v33 = vor.u32 %v3858_v26, %v3074_v27  ;;  %v3081_v34 = vor.u32 %v3867_v30, %v3080_v28  ;;  %v3008_v35 = vld [vmem:[#allocation6 + $0x200] sm:$0xf]  ;;  %v3842_v37 = vld [vmem:[#allocation6 + $0x204] sm:$0xf] }
  0x3f   : > { %1123 = vmatpush.bf16.msra.mxu2 %v3145_v21  ;;  %v3850_v36 = vld [vmem:[#allocation6 + $0x23c] sm:$0xf0]  ;;  %v3085_v38 = vor.u32 %v3859_v31, %v3082_v32  ;;  %v3010_v39 = vld [vmem:[#allocation6 + $0x240] sm:$0xf0]  ;;  %v3016_v40 = vld [vmem:[#allocation6 + $0x208] sm:$0xf] }
  0x40   : > { %1136 = vmatpush.bf16.msra.mxu3 %v3149_v25  ;;  %v3851_v41 = vld [vmem:[#allocation6 + $0x244] sm:$0xf0]  ;;  %v3843_v42 = vld [vmem:[#allocation6 + $0x20c] sm:$0xf]  ;;  %v3009_v44 = vor.u32 %v3850_v36, %v3008_v35  ;;  %v3013_v45 = vor.u32 %v3842_v37, %v3010_v39  ;;  %v2944_v47 = vld [vmem:[#allocation6 + $0x180] sm:$0xf] }
  0x41   : > { %v3018_v43 = vld [vmem:[#allocation6 + $0x248] sm:$0xf0]  ;;  %v3017_v46 = vor.u32 %v3851_v41, %v3016_v40  ;;  %v3834_v48 = vld [vmem:[#allocation6 + $0x1bc] sm:$0xf0]  ;;  %v3826_v49 = vld [vmem:[#allocation6 + $0x184] sm:$0xf] }
  0x42   : > { %1098 = vmatpush.bf16.msra.mxu0 %v3073_v29  ;;  %1111 = vmatpush.bf16.msra.mxu1 %v3077_v33  ;;  %v3021_v50 = vor.u32 %v3843_v42, %v3018_v43  ;;  %v2946_v51 = vld [vmem:[#allocation6 + $0x1c0] sm:$0xf0]  ;;  %v2952_v52 = vld [vmem:[#allocation6 + $0x188] sm:$0xf]  ;;  %v3827_v54 = vld [vmem:[#allocation6 + $0x18c] sm:$0xf]  ;;  %v2945_v56 = vor.u32 %v3834_v48, %v2944_v47 }
  0x43   : > { %1124 = vmatpush.bf16.msra.mxu2 %v3081_v34  ;;  %v3835_v53 = vld [vmem:[#allocation6 + $0x1c4] sm:$0xf0]  ;;  %v2954_v55 = vld [vmem:[#allocation6 + $0x1c8] sm:$0xf0]  ;;  %v2949_v57 = vor.u32 %v3826_v49, %v2946_v51  ;;  %v2880_v59 = vld [vmem:[#allocation6 + $0x100] sm:$0xf] }
  0x44   : > { %1137 = vmatpush.bf16.msra.mxu3 %v3085_v38  ;;  %v2953_v58 = vor.u32 %v3835_v53, %v2952_v52  ;;  %v3818_v60 = vld [vmem:[#allocation6 + $0x13c] sm:$0xf0]  ;;  %v3810_v61 = vld [vmem:[#allocation6 + $0x104] sm:$0xf]  ;;  %v2957_v62 = vor.u32 %v3827_v54, %v2954_v55  ;;  %v2888_v0 = vld [vmem:[#allocation6 + $0x108] sm:$0xf] }
  0x45   : > { %v2882_v63 = vld [vmem:[#allocation6 + $0x140] sm:$0xf0]  ;;  %v3819_v1 = vld [vmem:[#allocation6 + $0x144] sm:$0xf0]  ;;  %v3811_v2 = vld [vmem:[#allocation6 + $0x10c] sm:$0xf]  ;;  %v2881_v4 = vor.u32 %v3818_v60, %v2880_v59 }
  0x46   : > { %1099 = vmatpush.bf16.msra.mxu0 %v3009_v44  ;;  %1112 = vmatpush.bf16.msra.mxu1 %v3013_v45  ;;  %v2890_v3 = vld [vmem:[#allocation6 + $0x148] sm:$0xf0]  ;;  %v2885_v5 = vor.u32 %v3810_v61, %v2882_v63  ;;  %v2889_v6 = vor.u32 %v3819_v1, %v2888_v0  ;;  %v2816_v7 = vld [vmem:[#allocation6 + $0x80] sm:$0xf]  ;;  %v3794_v9 = vld [vmem:[#allocation6 + $0x84] sm:$0xf] }
  0x47   : > { %1125 = vmatpush.bf16.msra.mxu2 %v3017_v46  ;;  %v3802_v8 = vld [vmem:[#allocation6 + $0xbc] sm:$0xf0]  ;;  %v2893_v10 = vor.u32 %v3811_v2, %v2890_v3  ;;  %v2818_v11 = vld [vmem:[#allocation6 + $0xc0] sm:$0xf0]  ;;  %v2824_v12 = vld [vmem:[#allocation6 + $0x88] sm:$0xf] }
  0x48   : > { %1138 = vmatpush.bf16.msra.mxu3 %v3021_v50  ;;  %v3803_v13 = vld [vmem:[#allocation6 + $0xc4] sm:$0xf0]  ;;  %v3795_v14 = vld [vmem:[#allocation6 + $0x8c] sm:$0xf]  ;;  %v2817_v16 = vor.u32 %v3802_v8, %v2816_v7  ;;  %v2752_v17 = vld [vmem:[#allocation6] sm:$0xf]  ;;  %v2821_v19 = vor.u32 %v3794_v9, %v2818_v11 }
  0x49   : > { %v2826_v15 = vld [vmem:[#allocation6 + $0xc8] sm:$0xf0]  ;;  %v3786_v18 = vld [vmem:[#allocation6 + $0x3c] sm:$0xf0]  ;;  %v2825_v20 = vor.u32 %v3803_v13, %v2824_v12  ;;  %v3778_v21 = vld [vmem:[#allocation6 + $0x4] sm:$0xf] }
  0x4a   : > { %1100 = vmatpush.bf16.msra.mxu0 %v2945_v56  ;;  %1113 = vmatpush.bf16.msra.mxu1 %v2949_v57  ;;  %v2754_v22 = vld [vmem:[#allocation6 + $0x40] sm:$0xf0]  ;;  %v2760_v23 = vld [vmem:[#allocation6 + $0x8] sm:$0xf]  ;;  %v2829_v24 = vor.u32 %v3795_v14, %v2826_v15  ;;  %v3779_v26 = vld [vmem:[#allocation6 + $0xc] sm:$0xf]  ;;  %v2753_v31 = vor.u32 %v3786_v18, %v2752_v17 }
  0x4b   : > { %1126 = vmatpush.bf16.msra.mxu2 %v2953_v58  ;;  %v3787_v25 = vld [vmem:[#allocation6 + $0x44] sm:$0xf0]  ;;  %v2762_v27 = vld [vmem:[#allocation6 + $0x48] sm:$0xf0]  ;;  %v3216_v28 = vld [vmem:[#allocation6 + $0x390] sm:$0xf]  ;;  %v2757_v35 = vor.u32 %v3778_v21, %v2754_v22 }
  0x4c   : > { %1139 = vmatpush.bf16.msra.mxu3 %v2957_v62  ;;  %v3900_v29 = vld [vmem:[#allocation6 + $0x3cc] sm:$0xf0]  ;;  %v3892_v30 = vld [vmem:[#allocation6 + $0x394] sm:$0xf]  ;;  %v3224_v33 = vld [vmem:[#allocation6 + $0x398] sm:$0xf]  ;;  %v2761_v36 = vor.u32 %v3787_v25, %v2760_v23  ;;  %v2765_v39 = vor.u32 %v3779_v26, %v2762_v27 }
  0x4d   : > { %v3218_v32 = vld [vmem:[#allocation6 + $0x3d0] sm:$0xf0]  ;;  %v3901_v34 = vld [vmem:[#allocation6 + $0x3d4] sm:$0xf0]  ;;  %v3893_v37 = vld [vmem:[#allocation6 + $0x39c] sm:$0xf]  ;;  %v3217_v40 = vor.u32 %v3900_v29, %v3216_v28 }
  0x4e   : > { %1101 = vmatpush.bf16.msra.mxu0 %v2881_v4  ;;  %1114 = vmatpush.bf16.msra.mxu1 %v2885_v5  ;;  %v3226_v38 = vld [vmem:[#allocation6 + $0x3d8] sm:$0xf0]  ;;  %v3221_v41 = vor.u32 %v3892_v30, %v3218_v32  ;;  %v3225_v42 = vor.u32 %v3901_v34, %v3224_v33  ;;  %v3152_v43 = vld [vmem:[#allocation6 + $0x310] sm:$0xf]  ;;  %v3876_v45 = vld [vmem:[#allocation6 + $0x314] sm:$0xf] }
  0x4f   : > { %1127 = vmatpush.bf16.msra.mxu2 %v2889_v6  ;;  %v3884_v44 = vld [vmem:[#allocation6 + $0x34c] sm:$0xf0]  ;;  %v3229_v46 = vor.u32 %v3893_v37, %v3226_v38  ;;  %v3154_v47 = vld [vmem:[#allocation6 + $0x350] sm:$0xf0]  ;;  %v3160_v48 = vld [vmem:[#allocation6 + $0x318] sm:$0xf] }
  0x50   : > { %1140 = vmatpush.bf16.msra.mxu3 %v2893_v10  ;;  %v3885_v49 = vld [vmem:[#allocation6 + $0x354] sm:$0xf0]  ;;  %v3877_v50 = vld [vmem:[#allocation6 + $0x31c] sm:$0xf]  ;;  %v3153_v52 = vor.u32 %v3884_v44, %v3152_v43  ;;  %v3088_v53 = vld [vmem:[#allocation6 + $0x290] sm:$0xf]  ;;  %v3157_v54 = vor.u32 %v3876_v45, %v3154_v47 }
  0x51   : > { %v3162_v51 = vld [vmem:[#allocation6 + $0x358] sm:$0xf0]  ;;  %v3161_v55 = vor.u32 %v3885_v49, %v3160_v48  ;;  %v3868_v56 = vld [vmem:[#allocation6 + $0x2cc] sm:$0xf0]  ;;  %v3860_v57 = vld [vmem:[#allocation6 + $0x294] sm:$0xf] }
  0x52   : > { %1102 = vmatpush.bf16.msra.mxu0 %v2817_v16  ;;  %1115 = vmatpush.bf16.msra.mxu1 %v2821_v19  ;;  %v290_v58 = vld [vmem:[%s4466_s24] sm:$0xff]  ;;  %v3165_v59 = vor.u32 %v3877_v50, %v3162_v51  ;;  %v3089_v2 = vor.u32 %v3868_v56, %v3088_v53  ;;  %s3775_s15 = sshll.u32 %s4371_s25, 3  ;;  %s289_s27 = scalar_lea.vmem [#allocation11], %s2745_s13 }
  0x53   : > { %1128 = vmatpush.bf16.msra.mxu2 %v2825_v20  ;;  %v3090_v60 = vld [vmem:[#allocation6 + $0x2d0] sm:$0xf0]  ;;  %v3096_v61 = vld [vmem:[#allocation6 + $0x298] sm:$0xf]  ;;  %v4481_v63 = vpack.c.bf16 %v290_v58, %v290_v58  ;;  %v3861_v0 = vld [vmem:[#allocation6 + $0x29c] sm:$0xf]  ;;  %s2632_s22 = scalar_lea.hbm %s4562_s5, %s3775_s15 }
  0x54   : > { %1141 = vmatpush.bf16.msra.mxu3 %v2829_v24  ;;  %v3869_v62 = vld [vmem:[#allocation6 + $0x2d4] sm:$0xf0]  ;;  %v3098_v1 = vld [vmem:[#allocation6 + $0x2d8] sm:$0xf0]  ;;  %v3093_v3 = vor.u32 %v3860_v57, %v3090_v60  ;;  %v3024_v5 = vld [vmem:[#allocation6 + $0x210] sm:$0xf] }
  0x55   : > { %v3097_v4 = vor.u32 %v3869_v62, %v3096_v61  ;;  %v3852_v6 = vld [vmem:[#allocation6 + $0x24c] sm:$0xf0]  ;;  %v3844_v7 = vld [vmem:[#allocation6 + $0x214] sm:$0xf]  ;;  %v3101_v8 = vor.u32 %v3861_v0, %v3098_v1  ;;  %v3032_v10 = vld [vmem:[#allocation6 + $0x218] sm:$0xf] }
  0x56   : > { %1103 = vmatpush.bf16.msra.mxu0 %v2753_v31  ;;  %1116 = vmatpush.bf16.msra.mxu1 %v2757_v35  ;;  %v3026_v9 = vld [vmem:[#allocation6 + $0x250] sm:$0xf0]  ;;  %v3853_v11 = vld [vmem:[#allocation6 + $0x254] sm:$0xf0]  ;;  %v3845_v12 = vld [vmem:[#allocation6 + $0x21c] sm:$0xf]  ;;  %v3025_v14 = vor.u32 %v3852_v6, %v3024_v5 }
  0x57   : > { %1129 = vmatpush.bf16.msra.mxu2 %v2761_v36  ;;  %v3034_v13 = vld [vmem:[#allocation6 + $0x258] sm:$0xf0]  ;;  %v3029_v15 = vor.u32 %v3844_v7, %v3026_v9  ;;  %v3033_v16 = vor.u32 %v3853_v11, %v3032_v10  ;;  %v2960_v17 = vld [vmem:[#allocation6 + $0x190] sm:$0xf]  ;;  %v3828_v19 = vld [vmem:[#allocation6 + $0x194] sm:$0xf] }
  0x58   : > { %1142 = vmatpush.bf16.msra.mxu3 %v2765_v39  ;;  %v3836_v18 = vld [vmem:[#allocation6 + $0x1cc] sm:$0xf0]  ;;  %v3037_v20 = vor.u32 %v3845_v12, %v3034_v13  ;;  %v2962_v21 = vld [vmem:[#allocation6 + $0x1d0] sm:$0xf0]  ;;  %v2968_v22 = vld [vmem:[#allocation6 + $0x198] sm:$0xf] }
  0x59   : > { %1104 = vmatmul.bf16.vlgmr.msra.gmra.mxu0 %v4481_v63  ;;  %1117 = vmatmul.bf16.vlgmr.msra.gmra.mxu1 %v4481_v63  ;;  %v3837_v23 = vld [vmem:[#allocation6 + $0x1d4] sm:$0xf0]  ;;  %v3829_v24 = vld [vmem:[#allocation6 + $0x19c] sm:$0xf]  ;;  %v2961_v26 = vor.u32 %v3836_v18, %v2960_v17  ;;  %v2965_v27 = vor.u32 %v3828_v19, %v2962_v21  ;;  %v2896_v29 = vld [vmem:[#allocation6 + $0x110] sm:$0xf] }
  0x5a   : > { %1148 = vmatpush.bf16.msrb.mxu0 %v3217_v40  ;;  %1161 = vmatpush.bf16.msrb.mxu1 %v3221_v41  ;;  %v2970_v25 = vld [vmem:[#allocation6 + $0x1d8] sm:$0xf0]  ;;  %v2969_v28 = vor.u32 %v3837_v23, %v2968_v22  ;;  %v3820_v30 = vld [vmem:[#allocation6 + $0x14c] sm:$0xf0]  ;;  %v3812_v31 = vld [vmem:[#allocation6 + $0x114] sm:$0xf] }
  0x5b   : > { %1174 = vmatpush.bf16.msrb.mxu2 %v3225_v42  ;;  %1143 = vmatmul.bf16.vlgmr.msra.gmra.mxu3 %v4481_v63  ;;  %v2973_v32 = vor.u32 %v3829_v24, %v2970_v25  ;;  %v2898_v33 = vld [vmem:[#allocation6 + $0x150] sm:$0xf0]  ;;  %v2904_v34 = vld [vmem:[#allocation6 + $0x118] sm:$0xf]  ;;  %v3813_v36 = vld [vmem:[#allocation6 + $0x11c] sm:$0xf]  ;;  %v2897_v38 = vor.u32 %v3820_v30, %v2896_v29 }
  0x5c   : > { %1187 = vmatpush.bf16.msrb.mxu3 %v3229_v46  ;;  %1130 = vmatmul.bf16.vlgmr.msra.gmra.mxu2 %v4481_v63  ;;  %v3821_v35 = vld [vmem:[#allocation6 + $0x154] sm:$0xf0]  ;;  %v2906_v37 = vld [vmem:[#allocation6 + $0x158] sm:$0xf0]  ;;  %v2901_v39 = vor.u32 %v3812_v31, %v2898_v33  ;;  %v2832_v41 = vld [vmem:[#allocation6 + $0x90] sm:$0xf] }
  0x5d   : > { %v2905_v40 = vor.u32 %v3821_v35, %v2904_v34  ;;  %v3804_v42 = vld [vmem:[#allocation6 + $0xcc] sm:$0xf0]  ;;  %v3796_v43 = vld [vmem:[#allocation6 + $0x94] sm:$0xf]  ;;  %v2909_v44 = vor.u32 %v3813_v36, %v2906_v37  ;;  %v2840_v46 = vld [vmem:[#allocation6 + $0x98] sm:$0xf] }
  0x5e   : > { %1149 = vmatpush.bf16.msrb.mxu0 %v3153_v52  ;;  %1162 = vmatpush.bf16.msrb.mxu1 %v3157_v54  ;;  %v2834_v45 = vld [vmem:[#allocation6 + $0xd0] sm:$0xf0]  ;;  %v3805_v47 = vld [vmem:[#allocation6 + $0xd4] sm:$0xf0]  ;;  %v3797_v48 = vld [vmem:[#allocation6 + $0x9c] sm:$0xf]  ;;  %v2833_v50 = vor.u32 %v3804_v42, %v2832_v41 }
  0x5f   : > { %1175 = vmatpush.bf16.msrb.mxu2 %v3161_v55  ;;  %v2842_v49 = vld [vmem:[#allocation6 + $0xd8] sm:$0xf0]  ;;  %v2768_v51 = vld [vmem:[#allocation6 + $0x10] sm:$0xf]  ;;  %v2837_v53 = vor.u32 %v3796_v43, %v2834_v45  ;;  %v2841_v54 = vor.u32 %v3805_v47, %v2840_v46  ;;  %v3780_v55 = vld [vmem:[#allocation6 + $0x14] sm:$0xf] }
  0x60   : > { %1188 = vmatpush.bf16.msrb.mxu3 %v3165_v59  ;;  %v3788_v52 = vld [vmem:[#allocation6 + $0x4c] sm:$0xf0]  ;;  %v2770_v56 = vld [vmem:[#allocation6 + $0x50] sm:$0xf0]  ;;  %v2776_v57 = vld [vmem:[#allocation6 + $0x18] sm:$0xf]  ;;  %v2845_v58 = vor.u32 %v3797_v48, %v2842_v49 }
  0x61   : > { %v3789_v59 = vld [vmem:[#allocation6 + $0x54] sm:$0xf0]  ;;  %v3781_v60 = vld [vmem:[#allocation6 + $0x1c] sm:$0xf]  ;;  %v3232_v62 = vld [vmem:[#allocation6 + $0x3a0] sm:$0xf]  ;;  %v2773_v6 = vor.u32 %v3780_v55, %v2770_v56 }
  0x62   : > { %1150 = vmatpush.bf16.msrb.mxu0 %v3089_v2  ;;  %1163 = vmatpush.bf16.msrb.mxu1 %v3093_v3  ;;  %v2778_v61 = vld [vmem:[#allocation6 + $0x58] sm:$0xf0]  ;;  %v3902_v0 = vld [vmem:[#allocation6 + $0x3dc] sm:$0xf0]  ;;  %v3894_v1 = vld [vmem:[#allocation6 + $0x3a4] sm:$0xf]  ;;  %v2769_v2 = vor.u32 %v3788_v52, %v2768_v51  ;;  %v2777_v7 = vor.u32 %v3789_v59, %v2776_v57 }
  0x63   : > { %1176 = vmatpush.bf16.msrb.mxu2 %v3097_v4  ;;  %v3234_v3 = vld [vmem:[#allocation6 + $0x3e0] sm:$0xf0]  ;;  %v3240_v4 = vld [vmem:[#allocation6 + $0x3a8] sm:$0xf]  ;;  %v3242_v9 = vld [vmem:[#allocation6 + $0x3e8] sm:$0xf0]  ;;  %v2781_v10 = vor.u32 %v3781_v60, %v2778_v61  ;;  %v3233_v11 = vor.u32 %v3902_v0, %v3232_v62 }
  0x64   : > { %1189 = vmatpush.bf16.msrb.mxu3 %v3101_v8  ;;  %v3903_v5 = vld [vmem:[#allocation6 + $0x3e4] sm:$0xf0]  ;;  %v3895_v8 = vld [vmem:[#allocation6 + $0x3ac] sm:$0xf]  ;;  %v3237_v12 = vor.u32 %v3894_v1, %v3234_v3  ;;  %v3170_v18 = vld [vmem:[#allocation6 + $0x360] sm:$0xf0] }
  0x65   : > { %v3241_v13 = vor.u32 %v3903_v5, %v3240_v4  ;;  %v3245_v17 = vor.u32 %v3895_v8, %v3242_v9  ;;  %v3176_v19 = vld [vmem:[#allocation6 + $0x328] sm:$0xf]  ;;  %v3879_v21 = vld [vmem:[#allocation6 + $0x32c] sm:$0xf]  ;;  %v3106_v30 = vld [vmem:[#allocation6 + $0x2e0] sm:$0xf0] }
  0x66   : > { %1151 = vmatpush.bf16.msrb.mxu0 %v3025_v14  ;;  %1164 = vmatpush.bf16.msrb.mxu1 %v3029_v15  ;;  %v3168_v14 = vld [vmem:[#allocation6 + $0x320] sm:$0xf]  ;;  %v3178_v22 = vld [vmem:[#allocation6 + $0x368] sm:$0xf0]  ;;  %v3112_v31 = vld [vmem:[#allocation6 + $0x2a8] sm:$0xf] }
  0x67   : > { %1177 = vmatpush.bf16.msrb.mxu2 %v3033_v16  ;;  %v3886_v15 = vld [vmem:[#allocation6 + $0x35c] sm:$0xf0]  ;;  %v3878_v16 = vld [vmem:[#allocation6 + $0x324] sm:$0xf]  ;;  %v3181_v29 = vor.u32 %v3879_v21, %v3178_v22  ;;  %v3863_v33 = vld [vmem:[#allocation6 + $0x2ac] sm:$0xf] }
  0x68   : > { %1190 = vmatpush.bf16.msrb.mxu3 %v3037_v20  ;;  %v3887_v20 = vld [vmem:[#allocation6 + $0x364] sm:$0xf0]  ;;  %v3169_v23 = vor.u32 %v3886_v15, %v3168_v14  ;;  %v3173_v24 = vor.u32 %v3878_v16, %v3170_v18  ;;  %v3114_v34 = vld [vmem:[#allocation6 + $0x2e8] sm:$0xf0]  ;;  %v3042_v42 = vld [vmem:[#allocation6 + $0x260] sm:$0xf0] }
  0x69   : > { %v3177_v25 = vor.u32 %v3887_v20, %v3176_v19  ;;  %v3117_v41 = vor.u32 %v3863_v33, %v3114_v34  ;;  %v3048_v43 = vld [vmem:[#allocation6 + $0x228] sm:$0xf]  ;;  %v3847_v45 = vld [vmem:[#allocation6 + $0x22c] sm:$0xf]  ;;  %v3838_v51 = vld [vmem:[#allocation6 + $0x1dc] sm:$0xf0] }
  0x6a   : > { %1152 = vmatpush.bf16.msrb.mxu0 %v2961_v26  ;;  %1165 = vmatpush.bf16.msrb.mxu1 %v2965_v27  ;;  %v3104_v26 = vld [vmem:[#allocation6 + $0x2a0] sm:$0xf]  ;;  %v3050_v46 = vld [vmem:[#allocation6 + $0x268] sm:$0xf0]  ;;  %v3830_v52 = vld [vmem:[#allocation6 + $0x1a4] sm:$0xf] }
  0x6b   : > { %1178 = vmatpush.bf16.msrb.mxu2 %v2969_v28  ;;  %v3870_v27 = vld [vmem:[#allocation6 + $0x2dc] sm:$0xf0]  ;;  %v3862_v28 = vld [vmem:[#allocation6 + $0x2a4] sm:$0xf]  ;;  %v2984_v55 = vld [vmem:[#allocation6 + $0x1a8] sm:$0xf] }
  0x6c   : > { %1191 = vmatpush.bf16.msrb.mxu3 %v2973_v32  ;;  %v3871_v32 = vld [vmem:[#allocation6 + $0x2e4] sm:$0xf0]  ;;  %v3105_v35 = vor.u32 %v3870_v27, %v3104_v26  ;;  %v3109_v36 = vor.u32 %v3862_v28, %v3106_v30  ;;  %v3831_v57 = vld [vmem:[#allocation6 + $0x1ac] sm:$0xf]  ;;  %v2912_v62 = vld [vmem:[#allocation6 + $0x120] sm:$0xf] }
  0x6d   : > { %v3113_v37 = vor.u32 %v3871_v32, %v3112_v31  ;;  %v3839_v56 = vld [vmem:[#allocation6 + $0x1e4] sm:$0xf0]  ;;  %v3822_v0 = vld [vmem:[#allocation6 + $0x15c] sm:$0xf0]  ;;  %v3814_v1 = vld [vmem:[#allocation6 + $0x124] sm:$0xf] }
  0x6e   : > { %1153 = vmatpush.bf16.msrb.mxu0 %v2897_v38  ;;  %1166 = vmatpush.bf16.msrb.mxu1 %v2901_v39  ;;  %v3040_v38 = vld [vmem:[#allocation6 + $0x220] sm:$0xf]  ;;  %v2985_v61 = vor.u32 %v3839_v56, %v2984_v55  ;;  %v2914_v3 = vld [vmem:[#allocation6 + $0x160] sm:$0xf0]  ;;  %v2920_v4 = vld [vmem:[#allocation6 + $0x128] sm:$0xf]  ;;  %v2913_v8 = vor.u32 %v3822_v0, %v2912_v62 }
  0x6f   : > { %1179 = vmatpush.bf16.msrb.mxu2 %v2905_v40  ;;  %v3854_v39 = vld [vmem:[#allocation6 + $0x25c] sm:$0xf0]  ;;  %v3846_v40 = vld [vmem:[#allocation6 + $0x224] sm:$0xf]  ;;  %v3823_v5 = vld [vmem:[#allocation6 + $0x164] sm:$0xf0]  ;;  %v2917_v9 = vor.u32 %v3814_v1, %v2914_v3 }
  0x70   : > { %1192 = vmatpush.bf16.msrb.mxu3 %v2909_v44  ;;  %v3855_v44 = vld [vmem:[#allocation6 + $0x264] sm:$0xf0]  ;;  %v3041_v47 = vor.u32 %v3854_v39, %v3040_v38  ;;  %v3045_v48 = vor.u32 %v3846_v40, %v3042_v42  ;;  %v2850_v15 = vld [vmem:[#allocation6 + $0xe0] sm:$0xf0]  ;;  %v3799_v18 = vld [vmem:[#allocation6 + $0xac] sm:$0xf] }
  0x71   : > { %v3049_v49 = vor.u32 %v3855_v44, %v3048_v43  ;;  %v2856_v16 = vld [vmem:[#allocation6 + $0xa8] sm:$0xf]  ;;  %v2858_v19 = vld [vmem:[#allocation6 + $0xe8] sm:$0xf0]  ;;  %v2784_v21 = vld [vmem:[#allocation6 + $0x20] sm:$0xf] }
  0x72   : > { %1154 = vmatpush.bf16.msrb.mxu0 %v2833_v50  ;;  %1167 = vmatpush.bf16.msrb.mxu1 %v2837_v53  ;;  %v2976_v50 = vld [vmem:[#allocation6 + $0x1a0] sm:$0xf]  ;;  %v3053_v53 = vor.u32 %v3847_v45, %v3050_v46  ;;  %v2786_v26 = vld [vmem:[#allocation6 + $0x60] sm:$0xf0]  ;;  %v2792_v27 = vld [vmem:[#allocation6 + $0x28] sm:$0xf]  ;;  %v2861_v28 = vor.u32 %v3799_v18, %v2858_v19 }
  0x73   : > { %1180 = vmatpush.bf16.msrb.mxu2 %v2841_v54  ;;  %v2978_v54 = vld [vmem:[#allocation6 + $0x1e0] sm:$0xf0]  ;;  %v2977_v59 = vor.u32 %v3838_v51, %v2976_v50  ;;  %v3790_v22 = vld [vmem:[#allocation6 + $0x5c] sm:$0xf0]  ;;  %v3783_v30 = vld [vmem:[#allocation6 + $0x2c] sm:$0xf] }
  0x74   : > { %1193 = vmatpush.bf16.msrb.mxu3 %v2845_v58  ;;  %v2986_v58 = vld [vmem:[#allocation6 + $0x1e8] sm:$0xf0]  ;;  %v2981_v60 = vor.u32 %v3830_v52, %v2978_v54  ;;  %v3248_v32 = vld [vmem:[#allocation6 + $0x3b0] sm:$0xf]  ;;  %v3896_v34 = vld [vmem:[#allocation6 + $0x3b4] sm:$0xf] }
  0x75   : > { %v2794_v31 = vld [vmem:[#allocation6 + $0x68] sm:$0xf0]  ;;  %v3904_v33 = vld [vmem:[#allocation6 + $0x3ec] sm:$0xf0]  ;;  %v3905_v38 = vld [vmem:[#allocation6 + $0x3f4] sm:$0xf0] }
  0x76   : > { %1155 = vmatpush.bf16.msrb.mxu0 %v2769_v2  ;;  %1168 = vmatpush.bf16.msrb.mxu1 %v2773_v6  ;;  %v2989_v2 = vor.u32 %v3831_v57, %v2986_v58  ;;  %v3815_v6 = vld [vmem:[#allocation6 + $0x12c] sm:$0xf]  ;;  %v3258_v42 = vld [vmem:[#allocation6 + $0x3f8] sm:$0xf0]  ;;  %v2797_v43 = vor.u32 %v3783_v30, %v2794_v31  ;;  %v3249_v44 = vor.u32 %v3904_v33, %v3248_v32  ;;  %v3186_v51 = vld [vmem:[#allocation6 + $0x370] sm:$0xf0] }
  0x77   : > { %1181 = vmatpush.bf16.msrb.mxu2 %v2777_v7  ;;  %v2922_v7 = vld [vmem:[#allocation6 + $0x168] sm:$0xf0]  ;;  %v3192_v52 = vld [vmem:[#allocation6 + $0x338] sm:$0xf]  ;;  %v3881_v54 = vld [vmem:[#allocation6 + $0x33c] sm:$0xf] }
  0x78   : > { %1194 = vmatpush.bf16.msrb.mxu3 %v2781_v10  ;;  %v2921_v10 = vor.u32 %v3823_v5, %v2920_v4  ;;  %v2925_v14 = vor.u32 %v3815_v6, %v2922_v7  ;;  %v3194_v55 = vld [vmem:[#allocation6 + $0x378] sm:$0xf0]  ;;  %v3122_v0 = vld [vmem:[#allocation6 + $0x2f0] sm:$0xf0]  ;;  %v3128_v1 = vld [vmem:[#allocation6 + $0x2b8] sm:$0xf] }
  0x79   : > { %1156 = vmatmul.bf16.vlgmr.msrb.gmra.mxu0 %v4481_v63  ;;  %1169 = vmatmul.bf16.vlgmr.msrb.gmra.mxu1 %v4481_v63  ;;  %v3197_v62 = vor.u32 %v3881_v54, %v3194_v55  ;;  %v3865_v3 = vld [vmem:[#allocation6 + $0x2bc] sm:$0xf]  ;;  %v2928_v32 = vld [vmem:[#allocation6 + $0x130] sm:$0xf]  ;;  %s2634_s9 = sshll.u32 %s289_s27, 4  ;;  %s2636_s10 = sshll.u32 %s2632_s22, 4  ;;  %s2635_s9 = int_to_ptr.vmem [resolvable:$true] %s2634_s9  ;;  %s2637_s10 = int_to_ptr.hbm [resolvable:$true] %s2636_s10 }
  0x7a   : > { %1200 = vmatpush.bf16.msra.mxu0 %v3233_v11  ;;  %1213 = vmatpush.bf16.msra.mxu1 %v3237_v12  ;;  %v2848_v11 = vld [vmem:[#allocation6 + $0xa0] sm:$0xf]  ;;  %v3130_v4 = vld [vmem:[#allocation6 + $0x2f8] sm:$0xf0]  ;;  %v3824_v33 = vld [vmem:[#allocation6 + $0x16c] sm:$0xf0] }
  0x7b   : > { %1226 = vmatpush.bf16.msra.mxu2 %v3241_v13  ;;  %1195 = vmatmul.bf16.vlgmr.msrb.gmra.mxu3 %v4481_v63  ;;  %v3806_v12 = vld [vmem:[#allocation6 + $0xdc] sm:$0xf0]  ;;  %v3798_v13 = vld [vmem:[#allocation6 + $0xa4] sm:$0xf]  ;;  %s2622_s25 = scalar_lea.sflag [#allocation5], %s4460_s6  ;;  %s4249_s11 = sshra.s32 %s2637_s10, 4  ;;  %s4250_s11 = int_to_ptr.hbm [resolvable:$true] %s4249_s11 }
  0x7c   : > { %1239 = vmatpush.bf16.msra.mxu3 %v3245_v17  ;;  %1182 = vmatmul.bf16.vlgmr.msrb.gmra.mxu2 %v4481_v63  ;;  %v3807_v17 = vld [vmem:[#allocation6 + $0xe4] sm:$0xf0]  ;;  %v2849_v20 = vor.u32 %v3806_v12, %v2848_v11  ;;  %v3133_v11 = vor.u32 %v3865_v3, %v3130_v4  ;;  %v3058_v12 = vld [vmem:[#allocation6 + $0x270] sm:$0xf0]  ;;  %s4251_s12 = scalar_lea.hbm %s4250_s11, 8  ;;  %s4255_s24 = scalar_lea.hbm %s4562_s5, 16 }
  0x7d   : > { %p4252_p1 = scmp.ne.s32.totalorder %s4250_s11, %s4251_s12  ;;  %p4256_p12 = scmp.lt.s32.totalorder %s4250_s11, %s4562_s5 }
  0x7e   : > { %1201 = vmatpush.bf16.msra.mxu0 %v3169_v23  ;;  %1214 = vmatpush.bf16.msra.mxu1 %v3173_v24  ;;  %v2853_v23 = vor.u32 %v3798_v13, %v2850_v15  ;;  %v2857_v24 = vor.u32 %v3807_v17, %v2856_v16  ;;  %v3064_v13 = vld [vmem:[#allocation6 + $0x238] sm:$0xf]  ;;  %v3849_v15 = vld [vmem:[#allocation6 + $0x23c] sm:$0xf]  ;;  %p4257_p7 = scmp.lt.s32.totalorder %s4255_s24, %s4251_s12 }
  0x7f   : > { %1227 = vmatpush.bf16.msra.mxu2 %v3177_v25  ;;  %v3782_v25 = vld [vmem:[#allocation6 + $0x24] sm:$0xf]  ;;  %v3066_v16 = vld [vmem:[#allocation6 + $0x278] sm:$0xf0]  ;;  %p4253_p3 = pnand %p4252_p1, %p4429_p4 }
  0x80   : > { %1240 = vmatpush.bf16.msra.mxu3 %v3181_v29  ;;  %v3791_v29 = vld [vmem:[#allocation6 + $0x64] sm:$0xf0]  ;;  %v2789_v39 = vor.u32 %v3782_v25, %v2786_v26  ;;  %v3000_v25 = vld [vmem:[#allocation6 + $0x1b8] sm:$0xf]  ;;  %p4258_p8 = por %p4257_p7, %p4256_p12 }
  0x81   : > { %v2793_v40 = vor.u32 %v3791_v29, %v2792_v27  ;;  %v3841_v26 = vld [vmem:[#allocation6 + $0x1f4] sm:$0xf0]  ;;  %v3833_v27 = vld [vmem:[#allocation6 + $0x1bc] sm:$0xf]  ;;  %p4254_p5 = pneg %p4253_p3 }
  0x82   : > { %1202 = vmatpush.bf16.msra.mxu0 %v3105_v35  ;;  %1215 = vmatpush.bf16.msra.mxu1 %v3109_v36  ;;  %v2785_v35 = vor.u32 %v3790_v22, %v2784_v21  ;;  %v3250_v36 = vld [vmem:[#allocation6 + $0x3f0] sm:$0xf0]  ;;  %v3840_v21 = vld [vmem:[#allocation6 + $0x1ec] sm:$0xf0]  ;;  %v3001_v31 = vor.u32 %v3841_v26, %v3000_v25  ;;  %v3933_v25 = vld [vmem:[#allocation9 + $0xd8] sm:$0xff] }
  0x83   : > { %1228 = vmatpush.bf16.msra.mxu2 %v3113_v37  ;;  %v3256_v37 = vld [vmem:[#allocation6 + $0x3b8] sm:$0xf]  ;;  %v3253_v45 = vor.u32 %v3896_v34, %v3250_v36  ;;  %v3832_v22 = vld [vmem:[#allocation6 + $0x1b4] sm:$0xf]  ;;  %v3916_v26 = vld [vmem:[#allocation9 + $0x50] sm:$0xff]  ;;  %p4259_p9 = pnand %p4258_p8, %p4254_p5 }
  0x84   : > { %1241 = vmatpush.bf16.msra.mxu3 %v3117_v41  ;;  %v3897_v41 = vld [vmem:[#allocation6 + $0x3bc] sm:$0xf]  ;;  %v3257_v46 = vor.u32 %v3905_v38, %v3256_v37  ;;  %v3816_v34 = vld [vmem:[#allocation6 + $0x134] sm:$0xf]  ;;  %v2936_v37 = vld [vmem:[#allocation6 + $0x138] sm:$0xf] }
  0x85   : > { %v3261_v50 = vor.u32 %v3897_v41, %v3258_v42  ;;  %v2930_v36 = vld [vmem:[#allocation6 + $0x170] sm:$0xf0]  ;;  %v3825_v38 = vld [vmem:[#allocation6 + $0x174] sm:$0xf0]  ;;  %v2929_v41 = vor.u32 %v3824_v33, %v2928_v32 }
  0x86   : > { %1203 = vmatpush.bf16.msra.mxu0 %v3041_v47  ;;  %1216 = vmatpush.bf16.msra.mxu1 %v3045_v48  ;;  %v3184_v47 = vld [vmem:[#allocation6 + $0x330] sm:$0xf]  ;;  %v2933_v42 = vor.u32 %v3816_v34, %v2930_v36  ;;  %v3931_v33 = vld [vmem:[#allocation9 + $0xc8] sm:$0xff]  ;;  %v3945_v34 = vld [vmem:[#allocation9 + $0x138] sm:$0xff] }
  0x87   : > { %1229 = vmatpush.bf16.msra.mxu2 %v3049_v49  ;;  %v3888_v48 = vld [vmem:[#allocation6 + $0x36c] sm:$0xf0]  ;;  %v3880_v49 = vld [vmem:[#allocation6 + $0x334] sm:$0xf]  ;;  %v3953_v36 = vld [vmem:[#allocation9 + $0x178] sm:$0xff] }
  0x88   : > { %1242 = vmatpush.bf16.msra.mxu3 %v3053_v53  ;;  %v3889_v53 = vld [vmem:[#allocation6 + $0x374] sm:$0xf0]  ;;  %v3185_v56 = vor.u32 %v3888_v48, %v3184_v47  ;;  %v3189_v57 = vor.u32 %v3880_v49, %v3186_v51  ;;  %v2866_v48 = vld [vmem:[#allocation6 + $0xf0] sm:$0xf0]  ;;  %v3801_v51 = vld [vmem:[#allocation6 + $0xbc] sm:$0xf] }
  0x89   : > { %v3193_v58 = vor.u32 %v3889_v53, %v3192_v52  ;;  %v2872_v49 = vld [vmem:[#allocation6 + $0xb8] sm:$0xf]  ;;  %v2874_v52 = vld [vmem:[#allocation6 + $0xf8] sm:$0xf0]  ;;  %v3906_v32 = vld [vmem:[#allocation9] sm:$0xff] }
  0x8a   : > { %1204 = vmatpush.bf16.msra.mxu0 %v2977_v59  ;;  %1217 = vmatpush.bf16.msra.mxu1 %v2981_v60  ;;  %v3120_v59 = vld [vmem:[#allocation6 + $0x2b0] sm:$0xf] }
  0x8b   : > { %1230 = vmatpush.bf16.msra.mxu2 %v2985_v61  ;;  %v3872_v60 = vld [vmem:[#allocation6 + $0x2ec] sm:$0xf0]  ;;  %v3864_v61 = vld [vmem:[#allocation6 + $0x2b4] sm:$0xf] }
  0x8c   : > { %1243 = vmatpush.bf16.msra.mxu3 %v2989_v2  ;;  %v3873_v2 = vld [vmem:[#allocation6 + $0x2f4] sm:$0xf0]  ;;  %v3121_v5 = vor.u32 %v3872_v60, %v3120_v59  ;;  %v3125_v6 = vor.u32 %v3864_v61, %v3122_v0  ;;  %v2877_v59 = vor.u32 %v3801_v51, %v2874_v52  ;;  %v2802_v60 = vld [vmem:[#allocation6 + $0x70] sm:$0xf0]  ;;  %v3785_v0 = vld [vmem:[#allocation6 + $0x3c] sm:$0xf] }
  0x8d   : > { %v3129_v7 = vor.u32 %v3873_v2, %v3128_v1  ;;  %v2808_v61 = vld [vmem:[#allocation6 + $0x38] sm:$0xf]  ;;  %v2810_v1 = vld [vmem:[#allocation6 + $0x78] sm:$0xf0]  ;;  %v3950_v51 = vld [vmem:[#allocation9 + $0x160] sm:$0xff] }
  0x8e   : > { %1205 = vmatpush.bf16.msra.mxu0 %v2913_v8  ;;  %1218 = vmatpush.bf16.msra.mxu1 %v2917_v9  ;;  %v3056_v8 = vld [vmem:[#allocation6 + $0x230] sm:$0xf] }
  0x8f   : > { %1231 = vmatpush.bf16.msra.mxu2 %v2921_v10  ;;  %v3856_v9 = vld [vmem:[#allocation6 + $0x26c] sm:$0xf0]  ;;  %v3848_v10 = vld [vmem:[#allocation6 + $0x234] sm:$0xf] }
  0x90   : > { %1244 = vmatpush.bf16.msra.mxu3 %v2925_v14  ;;  %v3857_v14 = vld [vmem:[#allocation6 + $0x274] sm:$0xf0]  ;;  %v3057_v17 = vor.u32 %v3856_v9, %v3056_v8  ;;  %v3061_v18 = vor.u32 %v3848_v10, %v3058_v12  ;;  %v3929_v8 = vld [vmem:[#allocation9 + $0xb8] sm:$0xff]  ;;  %v3912_v9 = vld [vmem:[#allocation9 + $0x30] sm:$0xff] }
  0x91   : > { %v3065_v19 = vor.u32 %v3857_v14, %v3064_v13  ;;  %v3937_v10 = vld [vmem:[#allocation9 + $0xf8] sm:$0xff]  ;;  %v3928_v12 = vld [vmem:[#allocation9 + $0xb0] sm:$0xff]  ;;  %v3911_v13 = vld [vmem:[#allocation9 + $0x28] sm:$0xff] }
  0x92   : > { %1206 = vmatpush.bf16.msra.mxu0 %v2849_v20  ;;  %1219 = vmatpush.bf16.msra.mxu1 %v2853_v23  ;;  %v2992_v20 = vld [vmem:[#allocation6 + $0x1b0] sm:$0xf]  ;;  %v3069_v23 = vor.u32 %v3849_v15, %v3066_v16  ;;  %v3936_v14 = vld [vmem:[#allocation9 + $0xf0] sm:$0xff]  ;;  %v3919_v15 = vld [vmem:[#allocation9 + $0x68] sm:$0xff] }
  0x93   : > { %1232 = vmatpush.bf16.msra.mxu2 %v2857_v24  ;;  %v2994_v24 = vld [vmem:[#allocation6 + $0x1f0] sm:$0xf0]  ;;  %v2993_v29 = vor.u32 %v3840_v21, %v2992_v20  ;;  %v3927_v16 = vld [vmem:[#allocation9 + $0xa8] sm:$0xff] }
  0x94   : > { %1245 = vmatpush.bf16.msra.mxu3 %v2861_v28  ;;  %v3002_v28 = vld [vmem:[#allocation6 + $0x1f8] sm:$0xf0]  ;;  %v2997_v30 = vor.u32 %v3832_v22, %v2994_v24  ;;  %v3926_v20 = vld [vmem:[#allocation9 + $0xa0] sm:$0xff]  ;;  %v3917_v22 = vld [vmem:[#allocation9 + $0x58] sm:$0xff] }
  0x95   : > { %v3934_v21 = vld [vmem:[#allocation9 + $0xe0] sm:$0xff]  ;;  %v3908_v24 = vld [vmem:[#allocation9 + $0x10] sm:$0xff] }
  0x96   : > { %1207 = vmatpush.bf16.msra.mxu0 %v2785_v35  ;;  %1220 = vmatpush.bf16.msra.mxu1 %v2789_v39  ;;  %v3005_v35 = vor.u32 %v3833_v27, %v3002_v28  ;;  %v3817_v39 = vld [vmem:[#allocation6 + $0x13c] sm:$0xf]  ;;  %v3924_v27 = vld [vmem:[#allocation9 + $0x90] sm:$0xff] }
  0x97   : > { %1233 = vmatpush.bf16.msra.mxu2 %v2793_v40  ;;  %v2938_v40 = vld [vmem:[#allocation6 + $0x178] sm:$0xf0] }
  0x98   : > { %1246 = vmatpush.bf16.msra.mxu3 %v2797_v43  ;;  %v2937_v43 = vor.u32 %v3825_v38, %v2936_v37  ;;  %v2941_v47 = vor.u32 %v3817_v39, %v2938_v40  ;;  %v3907_v28 = vld [vmem:[#allocation9 + $0x8] sm:$0xff]  ;;  %v3922_v37 = vld [vmem:[#allocation9 + $0x80] sm:$0xff]  ;;  %v3961_v39 = vld [vmem:[#allocation9 + $0x1b8] sm:$0xff] }
  0x99   : > { %1208 = vmatmul.bf16.vlgmr.msra.gmra.mxu0 %v4481_v63  ;;  %1221 = vmatmul.bf16.vlgmr.msra.gmra.mxu1 %v4481_v63  ;;  %v3930_v38 = vld [vmem:[#allocation9 + $0xc0] sm:$0xff]  ;;  %v3944_v40 = vld [vmem:[#allocation9 + $0x130] sm:$0xff] }
  0x9a   : > { %1252 = vmatpush.bf16.msrb.mxu0 %v3249_v44  ;;  %1265 = vmatpush.bf16.msrb.mxu1 %v3253_v45  ;;  %v2864_v44 = vld [vmem:[#allocation6 + $0xb0] sm:$0xf] }
  0x9b   : > { %1278 = vmatpush.bf16.msrb.mxu2 %v3257_v46  ;;  %1247 = vmatmul.bf16.vlgmr.msra.gmra.mxu3 %v4481_v63  ;;  %v3808_v45 = vld [vmem:[#allocation6 + $0xec] sm:$0xf0]  ;;  %v3800_v46 = vld [vmem:[#allocation6 + $0xb4] sm:$0xf] }
  0x9c   : > { %1291 = vmatpush.bf16.msrb.mxu3 %v3261_v50  ;;  %1234 = vmatmul.bf16.vlgmr.msra.gmra.mxu2 %v4481_v63  ;;  %v3809_v50 = vld [vmem:[#allocation6 + $0xf4] sm:$0xf0]  ;;  %v2865_v53 = vor.u32 %v3808_v45, %v2864_v44  ;;  %v2869_v54 = vor.u32 %v3800_v46, %v2866_v48  ;;  %v3968_v45 = vld [vmem:[#allocation9 + $0x1f0] sm:$0xff]  ;;  %v3942_v48 = vld [vmem:[#allocation9 + $0x120] sm:$0xff] }
  0x9d   : > { %v2873_v55 = vor.u32 %v3809_v50, %v2872_v49  ;;  %v3943_v44 = vld [vmem:[#allocation9 + $0x128] sm:$0xff]  ;;  %v4499_v50 = vld [vmem:[#allocation8] sm:$0xff] }
  0x9e   : > { %1253 = vmatpush.bf16.msrb.mxu0 %v3185_v56  ;;  %1266 = vmatpush.bf16.msrb.mxu1 %v3189_v57  ;;  %v2800_v56 = vld [vmem:[#allocation6 + $0x30] sm:$0xf]  ;;  %v3951_v46 = vld [vmem:[#allocation9 + $0x168] sm:$0xff]  ;;  %v424_v52 = vperm.slane %v4499_v50, 0 }
  0x9f   : > { %1279 = vmatpush.bf16.msrb.mxu2 %v3193_v58  ;;  %v3792_v57 = vld [vmem:[#allocation6 + $0x6c] sm:$0xf0]  ;;  %v3784_v58 = vld [vmem:[#allocation6 + $0x34] sm:$0xf]  ;;  %v3967_v49 = vld [vmem:[#allocation9 + $0x1e8] sm:$0xff] }
  0xa0   : > { %1292 = vmatpush.bf16.msrb.mxu3 %v3197_v62  ;;  %v3793_v62 = vld [vmem:[#allocation6 + $0x74] sm:$0xf0]  ;;  %v2801_v2 = vor.u32 %v3792_v57, %v2800_v56  ;;  %v2805_v3 = vor.u32 %v3784_v58, %v2802_v60  ;;  %v3966_v57 = vld [vmem:[#allocation9 + $0x1e0] sm:$0xff]  ;;  %v3949_v60 = vld [vmem:[#allocation9 + $0x158] sm:$0xff] }
  0xa1   : > { %v2809_v4 = vor.u32 %v3793_v62, %v2808_v61  ;;  %v426_v61 = vperm.slane %v4499_v50, 2 }
  0xa2   : > { %1254 = vmatpush.bf16.msrb.mxu0 %v3121_v5  ;;  %1267 = vmatpush.bf16.msrb.mxu1 %v3125_v6  ;;  %v2813_v5 = vor.u32 %v3785_v0, %v2810_v1  ;;  %v3913_v6 = vld [vmem:[#allocation9 + $0x38] sm:$0xff] }
  0xa3   : > { %1280 = vmatpush.bf16.msrb.mxu2 %v3129_v7  ;;  %v3921_v7 = vld [vmem:[#allocation9 + $0x78] sm:$0xff] }
  0xa4   : > { %1293 = vmatpush.bf16.msrb.mxu3 %v3133_v11  ;;  %v3920_v11 = vld [vmem:[#allocation9 + $0x70] sm:$0xff]  ;;  %v3957_v0 = vld [vmem:[#allocation9 + $0x198] sm:$0xff] }
  0xa6   : > { %1255 = vmatpush.bf16.msrb.mxu0 %v3057_v17  ;;  %1268 = vmatpush.bf16.msrb.mxu1 %v3061_v18  ;;  %v3910_v17 = vld [vmem:[#allocation9 + $0x20] sm:$0xff]  ;;  %v3935_v18 = vld [vmem:[#allocation9 + $0xe8] sm:$0xff] }
  0xa7   : > { %1281 = vmatpush.bf16.msrb.mxu2 %v3065_v19  ;;  %v3918_v19 = vld [vmem:[#allocation9 + $0x60] sm:$0xff] }
  0xa8   : > { %1294 = vmatpush.bf16.msrb.mxu3 %v3069_v23  ;;  %v3925_v23 = vld [vmem:[#allocation9 + $0x98] sm:$0xff] }
  0xaa   : > { %1256 = vmatpush.bf16.msrb.mxu0 %v2993_v29  ;;  %1269 = vmatpush.bf16.msrb.mxu1 %v2997_v30  ;;  %v3932_v29 = vld [vmem:[#allocation9 + $0xd0] sm:$0xff]  ;;  %v3915_v30 = vld [vmem:[#allocation9 + $0x48] sm:$0xff] }
  0xab   : > { %1282 = vmatpush.bf16.msrb.mxu2 %v3001_v31  ;;  %v3923_v31 = vld [vmem:[#allocation9 + $0x88] sm:$0xff] }
  0xac   : > { %1295 = vmatpush.bf16.msrb.mxu3 %v3005_v35  ;;  %v3914_v35 = vld [vmem:[#allocation9 + $0x40] sm:$0xff] }
  0xae   : > { %1257 = vmatpush.bf16.msrb.mxu0 %v2929_v41  ;;  %1270 = vmatpush.bf16.msrb.mxu1 %v2933_v42  ;;  %v3969_v41 = vld [vmem:[#allocation9 + $0x1f8] sm:$0xff]  ;;  %v3952_v42 = vld [vmem:[#allocation9 + $0x170] sm:$0xff] }
  0xaf   : > { %1283 = vmatpush.bf16.msrb.mxu2 %v2937_v43  ;;  %v3960_v43 = vld [vmem:[#allocation9 + $0x1b0] sm:$0xff] }
  0xb0   : > { %1296 = vmatpush.bf16.msrb.mxu3 %v2941_v47  ;;  %v3959_v47 = vld [vmem:[#allocation9 + $0x1a8] sm:$0xff] }
  0xb2   : > { %1258 = vmatpush.bf16.msrb.mxu0 %v2865_v53  ;;  %1271 = vmatpush.bf16.msrb.mxu1 %v2869_v54  ;;  %v425_v53 = vperm.slane %v4499_v50, 1  ;;  %v3958_v54 = vld [vmem:[#allocation9 + $0x1a0] sm:$0xff] }
  0xb3   : > { %1284 = vmatpush.bf16.msrb.mxu2 %v2873_v55  ;;  %v3941_v55 = vld [vmem:[#allocation9 + $0x118] sm:$0xff] }
  0xb4   : > { %1297 = vmatpush.bf16.msrb.mxu3 %v2877_v59 }
  0xb6   : > { %1259 = vmatpush.bf16.msrb.mxu0 %v2801_v2  ;;  %1272 = vmatpush.bf16.msrb.mxu1 %v2805_v3  ;;  %v427_v2 = vperm.slane %v4499_v50, 3 }
  0xb7   : > { %1285 = vmatpush.bf16.msrb.mxu2 %v2809_v4  ;;  %v3940_v4 = vld [vmem:[#allocation9 + $0x110] sm:$0xff] }
  0xb8   : > { %1298 = vmatpush.bf16.msrb.mxu3 %v2813_v5  ;;  %v3965_v5 = vld [vmem:[#allocation9 + $0x1d8] sm:$0xff] }
  0xb9   : > { %1260 = vmatmul.bf16.vlgmr.msrb.gmra.mxu0 %v4481_v63  ;;  %1273 = vmatmul.bf16.vlgmr.msrb.gmra.mxu1 %v4481_v63 }
  0xba   : > { %2412 = vmatpush.bf16.msra.mxu0 %v3913_v6  ;;  %2425 = vmatpush.bf16.msra.mxu1 %v3921_v7  ;;  %v3948_v6 = vld [vmem:[#allocation9 + $0x150] sm:$0xff] }
  0xbb   : > { %1286 = vmatmul.bf16.vlgmr.msrb.gmra.mxu2 %v4481_v63  ;;  %1299 = vmatmul.bf16.vlgmr.msrb.gmra.mxu3 %v4481_v63  ;;  %v3909_v63 = vld [vmem:[#allocation9 + $0x18] sm:$0xff] }
  0xbc   : > { %2438 = vmatpush.bf16.msra.mxu2 %v3929_v8  ;;  %2451 = vmatpush.bf16.msra.mxu3 %v3937_v10 }
  0xbe   : > { %2413 = vmatpush.bf16.msra.mxu0 %v3912_v9  ;;  %2426 = vmatpush.bf16.msra.mxu1 %v3920_v11  ;;  %v3956_v11 = vld [vmem:[#allocation9 + $0x190] sm:$0xff] }
  0xc0   : > { %2439 = vmatpush.bf16.msra.mxu2 %v3928_v12  ;;  %2452 = vmatpush.bf16.msra.mxu3 %v3936_v14 }
  0xc2   : > { %2414 = vmatpush.bf16.msra.mxu0 %v3911_v13  ;;  %2427 = vmatpush.bf16.msra.mxu1 %v3919_v15  ;;  %v3939_v15 = vld [vmem:[#allocation9 + $0x108] sm:$0xff] }
  0xc4   : > { %2440 = vmatpush.bf16.msra.mxu2 %v3927_v16  ;;  %2453 = vmatpush.bf16.msra.mxu3 %v3935_v18 }
  0xc6   : > { %2415 = vmatpush.bf16.msra.mxu0 %v3910_v17  ;;  %2428 = vmatpush.bf16.msra.mxu1 %v3918_v19  ;;  %v3964_v17 = vld [vmem:[#allocation9 + $0x1d0] sm:$0xff]  ;;  %v3947_v19 = vld [vmem:[#allocation9 + $0x148] sm:$0xff] }
  0xc8   : > { %2441 = vmatpush.bf16.msra.mxu2 %v3926_v20  ;;  %2454 = vmatpush.bf16.msra.mxu3 %v3934_v21 }
  0xca   : > { %2416 = vmatpush.bf16.msra.mxu0 %v3909_v63  ;;  %2429 = vmatpush.bf16.msra.mxu1 %v3917_v22  ;;  %v3955_v63 = vld [vmem:[#allocation9 + $0x188] sm:$0xff] }
  0xcc   : > { %2442 = vmatpush.bf16.msra.mxu2 %v3925_v23  ;;  %2455 = vmatpush.bf16.msra.mxu3 %v3933_v25  ;;  %v3946_v25 = vld [vmem:[#allocation9 + $0x140] sm:$0xff] }
  0xce   : > { %2417 = vmatpush.bf16.msra.mxu0 %v3908_v24  ;;  %2430 = vmatpush.bf16.msra.mxu1 %v3916_v26  ;;  %v3938_v24 = vld [vmem:[#allocation9 + $0x100] sm:$0xff] }
  0xd0   : > { %2443 = vmatpush.bf16.msra.mxu2 %v3924_v27  ;;  %2456 = vmatpush.bf16.msra.mxu3 %v3932_v29  ;;  %v3963_v29 = vld [vmem:[#allocation9 + $0x1c8] sm:$0xff] }
  0xd2   : > { %2418 = vmatpush.bf16.msra.mxu0 %v3907_v28  ;;  %2431 = vmatpush.bf16.msra.mxu1 %v3915_v30  ;;  %v3977_v28 = vld [vmem:[#allocation9 + $0x238] sm:$0xff] }
  0xd4   : > { %2444 = vmatpush.bf16.msra.mxu2 %v3923_v31  ;;  %2457 = vmatpush.bf16.msra.mxu3 %v3931_v33  ;;  %v3985_v31 = vld [vmem:[#allocation9 + $0x278] sm:$0xff] }
  0xd5   : > { %v3993_v33 = vld [vmem:[#allocation9 + $0x2b8] sm:$0xff] }
  0xd6   : > { %2419 = vmatpush.bf16.msra.mxu0 %v3906_v32  ;;  %2432 = vmatpush.bf16.msra.mxu1 %v3914_v35  ;;  %v1105_v56 = vpop.f32.mrf.mxu0  ;;  %v1118_v59 = vpop.f32.mrf.mxu1  ;;  %v3954_v32 = vld [vmem:[#allocation9 + $0x180] sm:$0xff] }
  0xd7   : > { %v1106_v58 = vadd.f32 %v1105_v56, %v424_v52  ;;  %v1119_v62 = vadd.f32 %v1118_v59, %v425_v53  ;;  %v3962_v35 = vld [vmem:[#allocation9 + $0x1c0] sm:$0xff]  ;;  %v430_v53 = vperm.slane %v4499_v50, 6  ;;  %v3973_v56 = vld [vmem:[#allocation9 + $0x218] sm:$0xff] }
  0xd8   : > { %2445 = vmatpush.bf16.msra.mxu2 %v3922_v37  ;;  %2458 = vmatpush.bf16.msra.mxu3 %v3930_v38  ;;  %v4001_v37 = vld [vmem:[#allocation9 + $0x2f8] sm:$0xff]  ;;  %v3992_v38 = vld [vmem:[#allocation9 + $0x2b0] sm:$0xff]  ;;  %v3990_v52 = vld [vmem:[#allocation9 + $0x2a0] sm:$0xff] }
  0xd9   : > { %v1304_v3 = vpack.c.bf16 %v1119_v62, %v1106_v58  ;;  %v3981_v58 = vld [vmem:[#allocation9 + $0x258] sm:$0xff]  ;;  %v3998_v59 = vld [vmem:[#allocation9 + $0x2e0] sm:$0xff] }
  0xda   : > { %2464 = vmatpush.bf16.msrb.mxu0 %v3945_v34  ;;  %2477 = vmatpush.bf16.msrb.mxu1 %v3953_v36  ;;  %v3976_v34 = vld [vmem:[#allocation9 + $0x230] sm:$0xff] }
  0xdb   : > { %v1596_v8 = vunpack.c.l.b16 %v1304_v3  ;;  %v1597_v9 = vunpack.c.h.b16 %v1304_v3  ;;  %v3984_v36 = vld [vmem:[#allocation9 + $0x270] sm:$0xff] }
  0xdc   : > { %2490 = vmatpush.bf16.msrb.mxu2 %v3961_v39  ;;  %2503 = vmatpush.bf16.msrb.mxu3 %v3969_v41  ;;  %v3975_v39 = vld [vmem:[#allocation9 + $0x228] sm:$0xff]  ;;  %v4000_v41 = vld [vmem:[#allocation9 + $0x2f0] sm:$0xff] }
  0xdd   : > { %v1612_v13 = vpack.c.b16 %v1596_v8, %v1596_v8  ;;  %v1613_v14 = vpack.c.b16 %v1597_v9, %v1597_v9  ;;  %v3997_v8 = vld [vmem:[#allocation9 + $0x2d8] sm:$0xff] }
  0xde   : > { %2465 = vmatpush.bf16.msrb.mxu0 %v3944_v40  ;;  %2478 = vmatpush.bf16.msrb.mxu1 %v3952_v42  ;;  %v1144_v10 = vpop.f32.mrf.mxu3  ;;  %v1107_v16 = vpop.f32.mrf.mxu0  ;;  %v3983_v40 = vld [vmem:[#allocation9 + $0x268] sm:$0xff]  ;;  %v428_v42 = vperm.slane %v4499_v50, 4 }
  0xdf   : > { %v1131_v1 = vpop.f32.mrf.mxu2  ;;  %v1145_v12 = vadd.f32 %v1144_v10, %v427_v2  ;;  %v1120_v18 = vpop.f32.mrf.mxu1  ;;  %2420 = vmatmul.bf16.vlgmr.msra.gmra.mxu0 %v1612_v13  ;;  %2433 = vmatmul.bf16.vlgmr.msra.gmra.mxu1 %v1613_v14  ;;  %v3971_v14 = vld [vmem:[#allocation9 + $0x208] sm:$0xff] }
  0xe0   : > { %2491 = vmatpush.bf16.msrb.mxu2 %v3960_v43  ;;  %2504 = vmatpush.bf16.msrb.mxu3 %v3968_v45  ;;  %v1132_v7 = vadd.f32 %v1131_v1, %v426_v61  ;;  %v3991_v43 = vld [vmem:[#allocation9 + $0x2a8] sm:$0xff]  ;;  %v3974_v45 = vld [vmem:[#allocation9 + $0x220] sm:$0xff]  ;;  %v3989_v61 = vld [vmem:[#allocation9 + $0x298] sm:$0xff] }
  0xe2   : > { %2466 = vmatpush.bf16.msrb.mxu0 %v3943_v44  ;;  %2479 = vmatpush.bf16.msrb.mxu1 %v3951_v46  ;;  %v1305_v20 = vpack.c.bf16 %v1145_v12, %v1132_v7  ;;  %v429_v44 = vperm.slane %v4499_v50, 5  ;;  %v3980_v7 = vld [vmem:[#allocation9 + $0x250] sm:$0xff] }
  0xe4   : > { %2492 = vmatpush.bf16.msrb.mxu2 %v3959_v47  ;;  %2505 = vmatpush.bf16.msrb.mxu3 %v3967_v49  ;;  %v1598_v21 = vunpack.c.l.b16 %v1305_v20  ;;  %v1599_v22 = vunpack.c.h.b16 %v1305_v20  ;;  %v3982_v47 = vld [vmem:[#allocation9 + $0x260] sm:$0xff]  ;;  %v3987_v20 = vld [vmem:[#allocation9 + $0x288] sm:$0xff] }
  0xe6   : > { %2467 = vmatpush.bf16.msrb.mxu0 %v3942_v48  ;;  %2480 = vmatpush.bf16.msrb.mxu1 %v3950_v51  ;;  %v1614_v26 = vpack.c.b16 %v1598_v21, %v1598_v21  ;;  %v1615_v27 = vpack.c.b16 %v1599_v22, %v1599_v22  ;;  %v1146_v30 = vpop.f32.mrf.mxu3  ;;  %v3999_v48 = vld [vmem:[#allocation9 + $0x2e8] sm:$0xff]  ;;  %v3970_v21 = vld [vmem:[#allocation9 + $0x200] sm:$0xff] }
  0xe7   : > { %v1133_v23 = vpop.f32.mrf.mxu2  ;;  %v3978_v22 = vld [vmem:[#allocation9 + $0x240] sm:$0xff]  ;;  %v4016_v30 = vld [vmem:[#allocation9 + $0x370] sm:$0xff] }
  0xe8   : > { %2493 = vmatpush.bf16.msrb.mxu2 %v3958_v54  ;;  %2506 = vmatpush.bf16.msrb.mxu3 %v3966_v57  ;;  %v4009_v23 = vld [vmem:[#allocation9 + $0x338] sm:$0xff] }
  0xe9   : > { %2446 = vmatmul.bf16.vlgmr.msra.gmra.mxu2 %v1614_v26  ;;  %2459 = vmatmul.bf16.vlgmr.msra.gmra.mxu3 %v1615_v27  ;;  %v3986_v26 = vld [vmem:[#allocation9 + $0x280] sm:$0xff]  ;;  %v4025_v27 = vld [vmem:[#allocation9 + $0x3b8] sm:$0xff] }
  0xea   : > { %2468 = vmatpush.bf16.msrb.mxu0 %v3941_v55  ;;  %2481 = vmatpush.bf16.msrb.mxu1 %v3949_v60  ;;  %v431_v55 = vperm.slane %v4499_v50, 7 }
  0xec   : > { %2494 = vmatpush.bf16.msrb.mxu2 %v3957_v0  ;;  %2507 = vmatpush.bf16.msrb.mxu3 %v3965_v5 }
  0xee   : > { %2469 = vmatpush.bf16.msrb.mxu0 %v3940_v4  ;;  %2482 = vmatpush.bf16.msrb.mxu1 %v3948_v6  ;;  %v3972_v4 = vld [vmem:[#allocation9 + $0x210] sm:$0xff] }
  0xf0   : > { %2495 = vmatpush.bf16.msrb.mxu2 %v3956_v11  ;;  %2508 = vmatpush.bf16.msrb.mxu3 %v3964_v17  ;;  %v3988_v11 = vld [vmem:[#allocation9 + $0x290] sm:$0xff] }
  0xf2   : > { %2470 = vmatpush.bf16.msrb.mxu0 %v3939_v15  ;;  %2483 = vmatpush.bf16.msrb.mxu1 %v3947_v19  ;;  %v3979_v15 = vld [vmem:[#allocation9 + $0x248] sm:$0xff]  ;;  %v3996_v19 = vld [vmem:[#allocation9 + $0x2d0] sm:$0xff] }
  0xf4   : > { %2496 = vmatpush.bf16.msrb.mxu2 %v3955_v63  ;;  %2509 = vmatpush.bf16.msrb.mxu3 %v3963_v29  ;;  %v3994_v29 = vld [vmem:[#allocation9 + $0x2c0] sm:$0xff] }
  0xf6   : > { %2471 = vmatpush.bf16.msrb.mxu0 %v3938_v24  ;;  %2484 = vmatpush.bf16.msrb.mxu1 %v3946_v25  ;;  %v1157_v46 = vpop.f32.mrf.mxu0  ;;  %v1170_v51 = vpop.f32.mrf.mxu1  ;;  %v3995_v24 = vld [vmem:[#allocation9 + $0x2c8] sm:$0xff]  ;;  %v4017_v25 = vld [vmem:[#allocation9 + $0x378] sm:$0xff] }
  0xf7   : > { %v1158_v49 = vadd.f32 %v1157_v46, %v428_v42  ;;  %v1171_v54 = vadd.f32 %v1170_v51, %v429_v44  ;;  %v4014_v44 = vld [vmem:[#allocation9 + $0x360] sm:$0xff]  ;;  %v4005_v51 = vld [vmem:[#allocation9 + $0x318] sm:$0xff] }
  0xf8   : > { %2497 = vmatpush.bf16.msrb.mxu2 %v3954_v32  ;;  %2510 = vmatpush.bf16.msrb.mxu3 %v3962_v35  ;;  %v4509_v32 = vld [vmem:[#allocation8 + $0x8] sm:$0xff] }
  0xf9   : > { %v1306_v57 = vpack.c.bf16 %v1171_v54, %v1158_v49  ;;  %v432_v35 = vperm.slane %v4509_v32, 0  ;;  %v434_v49 = vperm.slane %v4509_v32, 2  ;;  %v4030_v54 = vld [vmem:[#allocation9 + $0x3e0] sm:$0xff] }
  0xfa   : > { %2516 = vmatpush.bf16.msra.mxu0 %v3977_v28  ;;  %2529 = vmatpush.bf16.msra.mxu1 %v3985_v31  ;;  %v4008_v28 = vld [vmem:[#allocation9 + $0x330] sm:$0xff]  ;;  %v4033_v31 = vld [vmem:[#allocation9 + $0x3f8] sm:$0xff] }
  0xfb   : > { %v1600_v1 = vunpack.c.l.b16 %v1306_v57  ;;  %v1601_v2 = vunpack.c.h.b16 %v1306_v57 }
  0xfc   : > { %2542 = vmatpush.bf16.msra.mxu2 %v3993_v33  ;;  %2555 = vmatpush.bf16.msra.mxu3 %v4001_v37  ;;  %v4024_v33 = vld [vmem:[#allocation9 + $0x3b0] sm:$0xff] }
  0xfd   : > { %v1616_v5 = vpack.c.b16 %v1600_v1, %v1600_v1  ;;  %v1617_v6 = vpack.c.b16 %v1601_v2, %v1601_v2  ;;  %v4032_v37 = vld [vmem:[#allocation9 + $0x3f0] sm:$0xff] }
  0xfe   : > { %2517 = vmatpush.bf16.msra.mxu0 %v3976_v34  ;;  %2530 = vmatpush.bf16.msra.mxu1 %v3984_v36  ;;  %v1196_v0 = vpop.f32.mrf.mxu3  ;;  %v1159_v50 = vpop.f32.mrf.mxu0  ;;  %v4007_v34 = vld [vmem:[#allocation9 + $0x328] sm:$0xff]  ;;  %v4004_v1 = vld [vmem:[#allocation9 + $0x310] sm:$0xff] }
  0xff   : > { %v1183_v60 = vpop.f32.mrf.mxu2  ;;  %v1197_v3 = vadd.f32 %v1196_v0, %v431_v55  ;;  %v1172_v10 = vpop.f32.mrf.mxu1  ;;  %2472 = vmatmul.bf16.vlgmr.msrb.gmra.mxu0 %v1616_v5  ;;  %2485 = vmatmul.bf16.vlgmr.msrb.gmra.mxu1 %v1617_v6  ;;  %v4015_v36 = vld [vmem:[#allocation9 + $0x368] sm:$0xff]  ;;  %v4029_v5 = vld [vmem:[#allocation9 + $0x3d8] sm:$0xff]  ;;  %v4020_v50 = vld [vmem:[#allocation9 + $0x390] sm:$0xff] }
 0x100   : > { %2543 = vmatpush.bf16.msra.mxu2 %v3992_v38  ;;  %2556 = vmatpush.bf16.msra.mxu3 %v4000_v41  ;;  %v1184_v62 = vadd.f32 %v1183_v60, %v430_v53  ;;  %v433_v38 = vperm.slane %v4509_v32, 1  ;;  %v4006_v41 = vld [vmem:[#allocation9 + $0x320] sm:$0xff]  ;;  %v4013_v53 = vld [vmem:[#allocation9 + $0x358] sm:$0xff]  ;;  %v4011_v10 = vld [vmem:[#allocation9 + $0x348] sm:$0xff] }
 0x102   : > { %2518 = vmatpush.bf16.msra.mxu0 %v3975_v39  ;;  %2531 = vmatpush.bf16.msra.mxu1 %v3983_v40  ;;  %v1307_v9 = vpack.c.bf16 %v1197_v3, %v1184_v62  ;;  %v4023_v39 = vld [vmem:[#allocation9 + $0x3a8] sm:$0xff] }
 0x104   : > { %2544 = vmatpush.bf16.msra.mxu2 %v3991_v43  ;;  %2557 = vmatpush.bf16.msra.mxu3 %v3999_v48  ;;  %v1602_v12 = vunpack.c.l.b16 %v1307_v9  ;;  %v1603_v13 = vunpack.c.h.b16 %v1307_v9 }
 0x106   : > { %2519 = vmatpush.bf16.msra.mxu0 %v3974_v45  ;;  %2532 = vmatpush.bf16.msra.mxu1 %v3982_v47  ;;  %v1618_v16 = vpack.c.b16 %v1602_v12, %v1602_v12  ;;  %v1619_v17 = vpack.c.b16 %v1603_v13, %v1603_v13  ;;  %v1198_v63 = vpop.f32.mrf.mxu3  ;;  %v4031_v45 = vld [vmem:[#allocation9 + $0x3e8] sm:$0xff]  ;;  %v4022_v47 = vld [vmem:[#allocation9 + $0x3a0] sm:$0xff] }
 0x107   : > { %v1185_v18 = vpop.f32.mrf.mxu2  ;;  %v4026_v63 = vld [vmem:[#allocation9 + $0x3c0] sm:$0xff] }
 0x108   : > { %2545 = vmatpush.bf16.msra.mxu2 %v3990_v52  ;;  %2558 = vmatpush.bf16.msra.mxu3 %v3998_v59  ;;  %v435_v52 = vperm.slane %v4509_v32, 3  ;;  %v4010_v18 = vld [vmem:[#allocation9 + $0x340] sm:$0xff] }
 0x109   : > { %2498 = vmatmul.bf16.vlgmr.msrb.gmra.mxu2 %v1618_v16  ;;  %2511 = vmatmul.bf16.vlgmr.msrb.gmra.mxu3 %v1619_v17  ;;  %v4002_v17 = vld [vmem:[#allocation9 + $0x300] sm:$0xff] }
 0x10a   : > { %2520 = vmatpush.bf16.msra.mxu0 %v3973_v56  ;;  %2533 = vmatpush.bf16.msra.mxu1 %v3981_v58  ;;  %v4021_v58 = vld [vmem:[#allocation9 + $0x398] sm:$0xff] }
 0x10c   : > { %2546 = vmatpush.bf16.msra.mxu2 %v3989_v61  ;;  %2559 = vmatpush.bf16.msra.mxu3 %v3997_v8 }
 0x10e   : > { %2521 = vmatpush.bf16.msra.mxu0 %v3972_v4  ;;  %2534 = vmatpush.bf16.msra.mxu1 %v3980_v7  ;;  %v4012_v4 = vld [vmem:[#allocation9 + $0x350] sm:$0xff]  ;;  %v4003_v7 = vld [vmem:[#allocation9 + $0x308] sm:$0xff] }
 0x110   : > { %2547 = vmatpush.bf16.msra.mxu2 %v3988_v11  ;;  %2560 = vmatpush.bf16.msra.mxu3 %v3996_v19  ;;  %v4028_v11 = vld [vmem:[#allocation9 + $0x3d0] sm:$0xff]  ;;  %v4027_v19 = vld [vmem:[#allocation9 + $0x3c8] sm:$0xff] }
 0x112   : > { %2522 = vmatpush.bf16.msra.mxu0 %v3971_v14  ;;  %2535 = vmatpush.bf16.msra.mxu1 %v3979_v15  ;;  %v4019_v15 = vld [vmem:[#allocation9 + $0x388] sm:$0xff] }
 0x114   : > { %2548 = vmatpush.bf16.msra.mxu2 %v3987_v20  ;;  %2561 = vmatpush.bf16.msra.mxu3 %v3995_v24  ;;  %v4018_v20 = vld [vmem:[#allocation9 + $0x380] sm:$0xff] }
 0x116   : > { %2523 = vmatpush.bf16.msra.mxu0 %v3970_v21  ;;  %2536 = vmatpush.bf16.msra.mxu1 %v3978_v22  ;;  %v1209_v40 = vpop.f32.mrf.mxu0  ;;  %v1222_v43 = vpop.f32.mrf.mxu1  ;;  %v436_v21 = vperm.slane %v4509_v32, 4  ;;  %v437_v22 = vperm.slane %v4509_v32, 5 }
 0x117   : > { %v1210_v42 = vadd.f32 %v1209_v40, %v432_v35  ;;  %v1223_v46 = vadd.f32 %v1222_v43, %v433_v38 }
 0x118   : > { %2549 = vmatpush.bf16.msra.mxu2 %v3986_v26  ;;  %2562 = vmatpush.bf16.msra.mxu3 %v3994_v29  ;;  %v439_v29 = vperm.slane %v4509_v32, 7 }
 0x119   : > { %v1308_v48 = vpack.c.bf16 %v1223_v46, %v1210_v42 }
 0x11a   : > { %2568 = vmatpush.bf16.msrb.mxu0 %v4009_v23  ;;  %2581 = vmatpush.bf16.msrb.mxu1 %v4017_v25 }
 0x11b   : > { %v1604_v55 = vunpack.c.l.b16 %v1308_v48  ;;  %v1605_v56 = vunpack.c.h.b16 %v1308_v48 }
 0x11c   : > { %2594 = vmatpush.bf16.msrb.mxu2 %v4025_v27  ;;  %2607 = vmatpush.bf16.msrb.mxu3 %v4033_v31 }
 0x11d   : > { %v1620_v59 = vpack.c.b16 %v1604_v55, %v1604_v55  ;;  %v1621_v60 = vpack.c.b16 %v1605_v56, %v1605_v56 }
 0x11e   : > { %2569 = vmatpush.bf16.msrb.mxu0 %v4008_v28  ;;  %2582 = vmatpush.bf16.msrb.mxu1 %v4016_v30  ;;  %v1248_v62 = vpop.f32.mrf.mxu3  ;;  %v1211_v0 = vpop.f32.mrf.mxu0  ;;  %v438_v28 = vperm.slane %v4509_v32, 6  ;;  %v4114_v32 = vld [vmem:[%s4561_s4] ss:$0 sm:$0xff] }
 0x11f   : > { %v1235_v57 = vpop.f32.mrf.mxu2  ;;  %v1249_v2 = vadd.f32 %v1248_v62, %v435_v52  ;;  %v1224_v3 = vpop.f32.mrf.mxu1  ;;  %2524 = vmatmul.bf16.vlgmr.msra.gmra.mxu0 %v1620_v59  ;;  %2537 = vmatmul.bf16.vlgmr.msra.gmra.mxu1 %v1621_v60 }
 0x120   : > { %2595 = vmatpush.bf16.msrb.mxu2 %v4024_v33  ;;  %2608 = vmatpush.bf16.msrb.mxu3 %v4032_v37  ;;  %v1236_v61 = vadd.f32 %v1235_v57, %v434_v49 }
 0x122   : > { %2570 = vmatpush.bf16.msrb.mxu0 %v4007_v34  ;;  %2583 = vmatpush.bf16.msrb.mxu1 %v4015_v36  ;;  %v1309_v6 = vpack.c.bf16 %v1249_v2, %v1236_v61 }
 0x124   : > { %2596 = vmatpush.bf16.msrb.mxu2 %v4023_v39  ;;  %2609 = vmatpush.bf16.msrb.mxu3 %v4031_v45  ;;  %v1606_v8 = vunpack.c.l.b16 %v1309_v6  ;;  %v1607_v9 = vunpack.c.h.b16 %v1309_v6 }
 0x126   : > { %2571 = vmatpush.bf16.msrb.mxu0 %v4006_v41  ;;  %2584 = vmatpush.bf16.msrb.mxu1 %v4014_v44  ;;  %v1622_v12 = vpack.c.b16 %v1606_v8, %v1606_v8  ;;  %v1623_v13 = vpack.c.b16 %v1607_v9, %v1607_v9  ;;  %v1250_v16 = vpop.f32.mrf.mxu3 }
 0x127   : > { %v1237_v14 = vpop.f32.mrf.mxu2 }
 0x128   : > { %2597 = vmatpush.bf16.msrb.mxu2 %v4022_v47  ;;  %2610 = vmatpush.bf16.msrb.mxu3 %v4030_v54 }
 0x129   : > { %2550 = vmatmul.bf16.vlgmr.msra.gmra.mxu2 %v1622_v12  ;;  %2563 = vmatmul.bf16.vlgmr.msra.gmra.mxu3 %v1623_v13 }
 0x12a   : > { %2572 = vmatpush.bf16.msrb.mxu0 %v4005_v51  ;;  %2585 = vmatpush.bf16.msrb.mxu1 %v4013_v53 }
 0x12c   : > { %2598 = vmatpush.bf16.msrb.mxu2 %v4021_v58  ;;  %2611 = vmatpush.bf16.msrb.mxu3 %v4029_v5 }
 0x12e   : > { %2573 = vmatpush.bf16.msrb.mxu0 %v4004_v1  ;;  %2586 = vmatpush.bf16.msrb.mxu1 %v4012_v4 }
 0x130   : > { %2599 = vmatpush.bf16.msrb.mxu2 %v4020_v50  ;;  %2612 = vmatpush.bf16.msrb.mxu3 %v4028_v11 }
 0x132   : > { %2574 = vmatpush.bf16.msrb.mxu0 %v4003_v7  ;;  %2587 = vmatpush.bf16.msrb.mxu1 %v4011_v10 }
 0x134   : > { %2600 = vmatpush.bf16.msrb.mxu2 %v4019_v15  ;;  %2613 = vmatpush.bf16.msrb.mxu3 %v4027_v19 }
 0x136   : > { %2575 = vmatpush.bf16.msrb.mxu0 %v4002_v17  ;;  %2588 = vmatpush.bf16.msrb.mxu1 %v4010_v18  ;;  %v1261_v23 = vpop.f32.mrf.mxu0  ;;  %v1274_v25 = vpop.f32.mrf.mxu1 }
 0x137   : > { %v1262_v24 = vadd.f32 %v1261_v23, %v436_v21  ;;  %v1275_v26 = vadd.f32 %v1274_v25, %v437_v22 }
 0x138   : > { %2601 = vmatpush.bf16.msrb.mxu2 %v4018_v20  ;;  %2614 = vmatpush.bf16.msrb.mxu3 %v4026_v63 }
 0x139   : > { %v1310_v27 = vpack.c.bf16 %v1275_v26, %v1262_v24 }
 0x13b   : > { %v1608_v30 = vunpack.c.l.b16 %v1310_v27  ;;  %v1609_v31 = vunpack.c.h.b16 %v1310_v27 }
 0x13d   : > { %v1624_v34 = vpack.c.b16 %v1608_v30, %v1608_v30  ;;  %v1625_v35 = vpack.c.b16 %v1609_v31, %v1609_v31 }
 0x13e   : > { %v1287_v33 = vpop.f32.mrf.mxu2  ;;  %v1300_v37 = vpop.f32.mrf.mxu3 }
 0x13f   : > { %v1288_v36 = vadd.f32 %v1287_v33, %v438_v28  ;;  %v1263_v38 = vpop.f32.mrf.mxu0  ;;  %v1301_v39 = vadd.f32 %v1300_v37, %v439_v29  ;;  %v1276_v40 = vpop.f32.mrf.mxu1  ;;  %2576 = vmatmul.bf16.vlgmr.msrb.gmra.mxu0 %v1624_v34  ;;  %2589 = vmatmul.bf16.vlgmr.msrb.gmra.mxu1 %v1625_v35 }
 0x141   : > { %v1311_v41 = vpack.c.bf16 %v1301_v39, %v1288_v36 }
 0x143   : > { %v1610_v42 = vunpack.c.l.b16 %v1311_v41  ;;  %v1611_v43 = vunpack.c.h.b16 %v1311_v41 }
 0x145   : > { %v1626_v44 = vpack.c.b16 %v1610_v42, %v1610_v42  ;;  %v1627_v45 = vpack.c.b16 %v1611_v43, %v1611_v43 }
 0x146   : > { %v1289_v46 = vpop.f32.mrf.mxu2  ;;  %v1302_v47 = vpop.f32.mrf.mxu3 }
 0x147   : > { %2602 = vmatmul.bf16.vlgmr.msrb.gmra.mxu2 %v1626_v44  ;;  %2615 = vmatmul.bf16.vlgmr.msrb.gmra.mxu3 %v1627_v45 }
 0x15c   : > { %v2421_v48 = vpop.f32.mrf.mxu0  ;;  %v2434_v49 = vpop.f32.mrf.mxu1 }
 0x15d   : > { %v2422_v51 = vadd.f32 %v4114_v32, %v2421_v48 }
 0x15f   : > { %v2435_v52 = vadd.f32 %v2434_v49, %v2422_v51 }
 0x164   : > { %v2423_v53 = vpop.f32.mrf.mxu0  ;;  %v2436_v54 = vpop.f32.mrf.mxu1 }
 0x16c   : > { %v2447_v55 = vpop.f32.mrf.mxu2  ;;  %v2460_v56 = vpop.f32.mrf.mxu3 }
 0x16d   : > { %v2448_v57 = vadd.f32 %v2447_v55, %v2435_v52 }
 0x16f   : > { %v2461_v58 = vadd.f32 %v2460_v56, %v2448_v57 }
 0x174   : > { %v2449_v59 = vpop.f32.mrf.mxu2  ;;  %v2462_v60 = vpop.f32.mrf.mxu3 }
 0x17c   : > { %v2473_v61 = vpop.f32.mrf.mxu0  ;;  %v2486_v62 = vpop.f32.mrf.mxu1 }
 0x17d   : > { %v2474_v9 = vadd.f32 %v2473_v61, %v2461_v58 }
 0x17f   : > { %v2487_v12 = vadd.f32 %v2486_v62, %v2474_v9 }
 0x184   : > { %v2475_v0 = vpop.f32.mrf.mxu0  ;;  %v2488_v1 = vpop.f32.mrf.mxu1 }
 0x18c   : > { %v2499_v2 = vpop.f32.mrf.mxu2  ;;  %v2512_v3 = vpop.f32.mrf.mxu3 }
 0x18d   : > { %v2500_v13 = vadd.f32 %v2499_v2, %v2487_v12 }
 0x18f   : > { %v2513_v16 = vadd.f32 %v2512_v3, %v2500_v13 }
 0x194   : > { %v2501_v4 = vpop.f32.mrf.mxu2  ;;  %v2514_v5 = vpop.f32.mrf.mxu3 }
 0x19c   : > { %v2525_v6 = vpop.f32.mrf.mxu0  ;;  %v2538_v50 = vpop.f32.mrf.mxu1 }
 0x19d   : > { %v2526_v17 = vadd.f32 %v2525_v6, %v2513_v16 }
 0x19f   : > { %v2539_v18 = vadd.f32 %v2538_v50, %v2526_v17 }
 0x1a4   : > { %v2527_v7 = vpop.f32.mrf.mxu0  ;;  %v2540_v8 = vpop.f32.mrf.mxu1 }
 0x1ac   : > { %v2551_v10 = vpop.f32.mrf.mxu2  ;;  %v2564_v11 = vpop.f32.mrf.mxu3 }
 0x1ad   : > { %v2552_v63 = vadd.f32 %v2551_v10, %v2539_v18 }
 0x1af   : > { %v2565_v21 = vadd.f32 %v2564_v11, %v2552_v63 }
 0x1b4   : > { %v2553_v14 = vpop.f32.mrf.mxu2  ;;  %v2566_v15 = vpop.f32.mrf.mxu3 }
 0x1bc   : > { %v2577_v19 = vpop.f32.mrf.mxu0  ;;  %v2590_v20 = vpop.f32.mrf.mxu1 }
 0x1bd   : > { %v2578_v22 = vadd.f32 %v2577_v19, %v2565_v21 }
 0x1bf   : > { %v2591_v25 = vadd.f32 %v2590_v20, %v2578_v22 }
 0x1c4   : > { %v2579_v23 = vpop.f32.mrf.mxu0  ;;  %v2592_v24 = vpop.f32.mrf.mxu1 }
 0x1ca   : > { %v2603_v26 = vpop.f32.mrf.mxu2  ;;  %v2616_v27 = vpop.f32.mrf.mxu3 }
 0x1cb   : > { %v2604_v28 = vadd.f32 %v2603_v26, %v2591_v25 }
 0x1cd   : > { %v2617_v29 = vadd.f32 %v2616_v27, %v2604_v28 }
 0x1cf   : > { %2620 = vst [vmem:[%s289_s27] sm:$0xff] %v2617_v29 }
 0x1d0   : > { %4262 = shalt.err (!%p4259_p9)
}
 0x1d1   : > { %4048 = dma.vmem_to_hbm [thread:$0]  (%p4429_p4), %s2635_s9, 128, %s2637_s10, %s2622_s25  }
 0x1d2   : > { %v2605_v30 = vpop.f32.mrf.mxu2  ;;  %v2618_v31 = vpop.f32.mrf.mxu3 }
 0x1d3 PF: > { %s2648_s6 = sand.u32 1, %s4297_s18   ;;  %p4570_p10 = scmp.ge.s32.totalorder %s4309_s21, 2 }
 0x1d4   : > { %s2649_s30 = scalar_lea.sflag [#allocation5], %s2648_s6 }
 0x1d5   : > { %p4065_p13 = pnand %p4570_p10, %p4433_p6 }
 0x1d7   : > { %p4066_p11 = pneg %p4065_p13 }
 0x1d9   : > { %4292 = dma.done.wait (%p4066_p11), %s2649_s30, 128  }
 0x1da   : > { %4294 = vsyncadd (%p4066_p11), %s2649_s30, 4294967168  ;;  %p20_p4 = scmp.ge.s32.totalorder %s4403_s23, 4   ;;  %s4571_s18 = smov %s4301_s19 }
 0x1db   : > { %s4572_s19 = smov %s4305_s20  ;;  %s4573_s20 = smov %s4414_s28 }
 0x1dc   : > { %s4574_s21 = smov %s4403_s23  ;;  %22 = sbr.rel (!%p20_p4) target bundleno = 7 (0x7), region = 97 }
 0x1e1   :  { %2655 = vsyncpa [#allocation4], 1 }
 0x1e2   :  { %2657 = vsyncpa [#allocation4 + $0x1], 1 }
 0x1e3   :  { %2658 = vsyncpa [#allocation7], 1 }
 0x1e4   :  { %2659 = vsyncpa [#allocation10], 1 }
 0x1e5   :  { %2660 = vsyncpa [#allocation5], 1 }
 0x1e6   :  { %2662 = vsyncpa [#allocation5 + $0x1], 1 }

</bundles_post_ra>
